<compile_context>
chip_gen: v7x
topology: tpu7x:2x2x1
jax: 0.10.0
libtpu: 0.0.40
codegen_flags: <defaults>
</compile_context>

<pallas_src>
import jax
import jax.numpy as jnp
import numpy as np
from jax.experimental import pallas as pl
from jax.experimental.pallas import tpu as pltpu


# ----------------------------------------------------------------------------
# Fused Pallas kernel: all LSTM layers + FC in one call
# ----------------------------------------------------------------------------
def _make_fused_kernel(num_layers, seq_len, batch, hidden):
  """Builds a kernel closed over static (L, T, B, H)."""
  L, T, B, H = num_layers, seq_len, batch, hidden

  def kernel(*refs):
    # --- inputs -------------------------------------------------------------
    x_ref, h0_ref, c0_ref = refs[0], refs[1], refs[2]      # (T*B,E),(L,B,H)x2
    layer_refs = refs[3:3 + 3 * L]                          # (w_ih,w_hh,b)*L
    w_fc_ref, b_fc_ref = refs[3 + 3 * L], refs[4 + 3 * L]   # (H,V),(1,V)
    # --- outputs ------------------------------------------------------------
    logits_ref = refs[5 + 3 * L]                            # (T*B, V)
    hN_ref = refs[6 + 3 * L]                                # (L, B, H)
    cN_ref = refs[7 + 3 * L]                                # (L, B, H)
    # --- scratch (VMEM, ping-pong layer activations) ------------------------
    act_refs = (refs[8 + 3 * L], refs[9 + 3 * L])           # 2 x (T*B, H) f32

    for layer in range(L):
      w_ih = layer_refs[3 * layer][...]        # (E_in, 4H)
      w_hh = layer_refs[3 * layer + 1][...]    # (H, 4H)
      b = layer_refs[3 * layer + 2][...]       # (1, 4H)

      # Input projection + bias for ALL timesteps as one batched matmul;
      # only h @ w_hh is left on the serial recurrence path.
      src = x_ref if layer == 0 else act_refs[(layer - 1) % 2]
      gx = jnp.dot(src[...], w_ih,
                   preferred_element_type=jnp.float32) + b              # (T*B,4H)

      out_act = act_refs[layer % 2]            # this layer's output buffer
      h = h0_ref[layer]                        # (B, H)
      c = c0_ref[layer]                        # (B, H)
      for t in range(T):                       # fully unrolled, static slices
        gates = gx[t * B:(t + 1) * B, :] + jnp.dot(
            h, w_hh, preferred_element_type=jnp.float32)                # (B,4H)
        # PyTorch gate order: i, f, g, o
        i_g = jax.nn.sigmoid(gates[:, 0 * H:1 * H])
        f_g = jax.nn.sigmoid(gates[:, 1 * H:2 * H])
        g_g = jnp.tanh(gates[:, 2 * H:3 * H])
        o_g = jax.nn.sigmoid(gates[:, 3 * H:4 * H])
        c = f_g * c + i_g * g_g
        h = o_g * jnp.tanh(c)
        out_act[t * B:(t + 1) * B, :] = h      # store step output to scratch

      hN_ref[layer] = h                        # written once per layer
      cN_ref[layer] = c

    # Final FC over all T*B rows at once, reading the last layer's scratch.
    # TODO(synk): for realistic vocab sizes (V >= 30k) w_fc must be V-tiled
    # with a grid (lane-dense >=128-wide output blocks, vmem_limit_bytes set)
    # instead of living fully in VMEM; fine at these toy shapes.
    logits_ref[...] = (
        jnp.dot(act_refs[(L - 1) % 2][...], w_fc_ref[...],
                preferred_element_type=jnp.float32)
        + b_fc_ref[...])

  return kernel


# ----------------------------------------------------------------------------
# Wrapper
# ----------------------------------------------------------------------------
@jax.jit
def lstm_word2vec_forward(tokens, hidden, memory, params):
  """tokens: (B, T) int32, hidden/memory: (L, B, H). Returns (logits, h, c)."""
  B, T = tokens.shape
  L, _, H = hidden.shape
  E = params["embedding"].shape[1]
  V = params["w_fc"].shape[-1]

  # Embedding lookup (data-dependent gather) is plain-JAX glue outside the
  # kernel; produced directly in time-major layout (row = t*B + b).
  x_tm = jnp.take(params["embedding"], tokens.T, axis=0)    # (T, B, E)
  x2d = x_tm.reshape(T * B, E)

  ins = [x2d, hidden, memory]
  for layer in range(L):
    ins += [params[f"w_ih_{layer}"], params[f"w_hh_{layer}"],
            params[f"b_{layer}"]]
  ins += [params["w_fc"], params["b_fc"]]

  vmem = pl.BlockSpec(memory_space=pltpu.MemorySpace.VMEM)
  logits2d, h_n, c_n = pl.pallas_call(
      _make_fused_kernel(L, T, B, H),
      out_shape=(
          jax.ShapeDtypeStruct((T * B, V), jnp.float32),
          jax.ShapeDtypeStruct((L, B, H), jnp.float32),
          jax.ShapeDtypeStruct((L, B, H), jnp.float32),
      ),
      in_specs=[vmem] * len(ins),
      out_specs=(vmem, vmem, vmem),
      scratch_shapes=[
          pltpu.VMEM((T * B, H), jnp.float32),   # layer activations, buffer A
          pltpu.VMEM((T * B, H), jnp.float32),   # layer activations, buffer B
      ],
  )(*ins)

  logits = jnp.transpose(logits2d.reshape(T, B, V), (1, 0, 2))   # (B, T, V)
  return logits, h_n, c_n


# ----------------------------------------------------------------------------
# Pure-JAX reference (for correctness check)
# ----------------------------------------------------------------------------
def lstm_word2vec_reference(tokens, hidden, memory, params):
  emb = jnp.take(params["embedding"], tokens, axis=0)  # (B, T, E)
  B, T, _ = emb.shape
  L, _, H = hidden.shape
  hp = jax.lax.Precision.HIGHEST
  x = emb
  hs, cs = [], []
  for layer in range(L):
    w_ih = params[f"w_ih_{layer}"]
    w_hh = params[f"w_hh_{layer}"]
    b = params[f"b_{layer}"][0]
    h = hidden[layer]
    c = memory[layer]
    outs = []
    for t in range(T):
      gates = (jnp.dot(x[:, t], w_ih, precision=hp)
               + jnp.dot(h, w_hh, precision=hp) + b)
      i_g = jax.nn.sigmoid(gates[:, 0 * H:1 * H])
      f_g = jax.nn.sigmoid(gates[:, 1 * H:2 * H])
      g_g = jnp.tanh(gates[:, 2 * H:3 * H])
      o_g = jax.nn.sigmoid(gates[:, 3 * H:4 * H])
      c = f_g * c + i_g * g_g
      h = o_g * jnp.tanh(c)
      outs.append(h)
    x = jnp.stack(outs, axis=1)
    hs.append(h)
    cs.append(c)
  logits = jnp.dot(x, params["w_fc"], precision=hp) + params["b_fc"][0]
  return logits, jnp.stack(hs, axis=0), jnp.stack(cs, axis=0)


# ----------------------------------------------------------------------------
# Main
# ----------------------------------------------------------------------------
if __name__ == "__main__":
  # Small shapes consistent with the module.
  V = 64          # vocab_size
  E = 16          # w2v embedding dim
  H = 32          # hidden_size
  L = 2           # num_layers
  B = 2           # batch
  T = 8           # sequence length

  key = jax.random.PRNGKey(0)
  keys = jax.random.split(key, 16)

  params = {}
  # Frozen word2vec-style embedding matrix (deterministic synthetic init).
  params["embedding"] = 0.1 * jax.random.normal(keys[0], (V, E), jnp.float32)
  for layer in range(L):
    e_in = E if layer == 0 else H
    params[f"w_ih_{layer}"] = 0.1 * jax.random.normal(
        keys[1 + 3 * layer], (e_in, 4 * H), jnp.float32)
    params[f"w_hh_{layer}"] = 0.1 * jax.random.normal(
        keys[2 + 3 * layer], (H, 4 * H), jnp.float32)
    # combined bias (b_ih + b_hh in PyTorch); kept 2D for lane-friendly layout
    params[f"b_{layer}"] = 0.1 * jax.random.normal(
        keys[3 + 3 * layer], (1, 4 * H), jnp.float32)
  params["w_fc"] = 0.1 * jax.random.normal(keys[10], (H, V), jnp.float32)
  params["b_fc"] = 0.1 * jax.random.normal(keys[11], (1, V), jnp.float32)

  tokens = jax.random.randint(keys[12], (B, T), 0, V, dtype=jnp.int32)
  hidden0 = 0.1 * jax.random.normal(keys[13], (L, B, H), jnp.float32)
  memory0 = 0.1 * jax.random.normal(keys[14], (L, B, H), jnp.float32)

  logits, h_n, c_n = lstm_word2vec_forward(tokens, hidden0, memory0, params)
  jax.block_until_ready((logits, h_n, c_n))

  # Correctness check against pure-JAX reference.
  ref_logits, ref_h, ref_c = lstm_word2vec_reference(
      tokens, hidden0, memory0, params)
  np.testing.assert_allclose(np.asarray(logits), np.asarray(ref_logits),
                             rtol=2e-2, atol=2e-2)
  np.testing.assert_allclose(np.asarray(h_n), np.asarray(ref_h),
                             rtol=2e-2, atol=2e-2)
  np.testing.assert_allclose(np.asarray(c_n), np.asarray(ref_c),
                             rtol=2e-2, atol=2e-2)

  assert logits.shape == (B, T, V)
  assert h_n.shape == (L, B, H) and c_n.shape == (L, B, H)
  print("KERNEL_OK")
</pallas_src>

<mosaic_0001>
module attributes {stable_mosaic.version = 11 : i64} {
  func.func @kernel(%arg0: memref<16x16xf32, #tpu.memory_space<vmem>>, %arg1: memref<2x2x32xf32, #tpu.memory_space<vmem>>, %arg2: memref<2x2x32xf32, #tpu.memory_space<vmem>>, %arg3: memref<16x128xf32, #tpu.memory_space<vmem>>, %arg4: memref<32x128xf32, #tpu.memory_space<vmem>>, %arg5: memref<1x128xf32, #tpu.memory_space<vmem>>, %arg6: memref<32x128xf32, #tpu.memory_space<vmem>>, %arg7: memref<32x128xf32, #tpu.memory_space<vmem>>, %arg8: memref<1x128xf32, #tpu.memory_space<vmem>>, %arg9: memref<32x64xf32, #tpu.memory_space<vmem>>, %arg10: memref<1x64xf32, #tpu.memory_space<vmem>>, %arg11: memref<16x64xf32, #tpu.memory_space<vmem>>, %arg12: memref<2x2x32xf32, #tpu.memory_space<vmem>>, %arg13: memref<2x2x32xf32, #tpu.memory_space<vmem>>, %arg14: memref<16x32xf32, #tpu.memory_space<vmem>>, %arg15: memref<16x32xf32, #tpu.memory_space<vmem>>) attributes {dimension_semantics = [], scalar_prefetch = 0 : i64, scratch_operands = 2 : i64, tpu.core_type = #tpu.core_type<tc>} {
    %c0 = arith.constant 0 : index
    %c0_0 = arith.constant 0 : index
    %0 = vector.load %arg3[%c0, %c0_0] : memref<16x128xf32, #tpu.memory_space<vmem>>, vector<16x128xf32>
    %c0_1 = arith.constant 0 : index
    %c0_2 = arith.constant 0 : index
    %1 = vector.load %arg4[%c0_1, %c0_2] : memref<32x128xf32, #tpu.memory_space<vmem>>, vector<32x128xf32>
    %c0_3 = arith.constant 0 : index
    %c0_4 = arith.constant 0 : index
    %2 = vector.load %arg5[%c0_3, %c0_4] : memref<1x128xf32, #tpu.memory_space<vmem>>, vector<1x128xf32>
    %c0_5 = arith.constant 0 : index
    %c0_6 = arith.constant 0 : index
    %3 = vector.load %arg0[%c0_5, %c0_6] : memref<16x16xf32, #tpu.memory_space<vmem>>, vector<16x16xf32>
    %cst = arith.constant dense<0.000000e+00> : vector<16x128xf32>
    %4 = tpu.matmul %3, %0, %cst {dimension_numbers = #tpu.dot_dimension_numbers<[1], [0], [0], [1], [0, 0, 1, 1], [], []>} : vector<16x16xf32>, vector<16x128xf32>, vector<16x128xf32> -> vector<16x128xf32>
    %5 = vector.broadcast %2 : vector<1x128xf32> to vector<16x128xf32>
    %6 = arith.addf %4, %5 : vector<16x128xf32>
    %c0_7 = arith.constant 0 : index
    %c0_8 = arith.constant 0 : index
    %c0_9 = arith.constant 0 : index
    %7 = vector.load %arg1[%c0_7, %c0_8, %c0_9] : memref<2x2x32xf32, #tpu.memory_space<vmem>>, vector<1x2x32xf32>
    %8 = vector.shape_cast %7 : vector<1x2x32xf32> to vector<2x32xf32>
    %c0_10 = arith.constant 0 : index
    %c0_11 = arith.constant 0 : index
    %c0_12 = arith.constant 0 : index
    %9 = vector.load %arg2[%c0_10, %c0_11, %c0_12] : memref<2x2x32xf32, #tpu.memory_space<vmem>>, vector<1x2x32xf32>
    %10 = vector.shape_cast %9 : vector<1x2x32xf32> to vector<2x32xf32>
    %11 = vector.extract_strided_slice %6 {offsets = [0, 0], sizes = [2, 128], strides = [1, 1]} : vector<16x128xf32> to vector<2x128xf32>
    %cst_13 = arith.constant dense<0.000000e+00> : vector<2x128xf32>
    %12 = tpu.matmul %8, %1, %cst_13 {dimension_numbers = #tpu.dot_dimension_numbers<[1], [0], [0], [1], [0, 0, 1, 1], [], []>} : vector<2x32xf32>, vector<32x128xf32>, vector<2x128xf32> -> vector<2x128xf32>
    %13 = arith.addf %11, %12 : vector<2x128xf32>
    %14 = vector.extract_strided_slice %13 {offsets = [0, 0], sizes = [2, 32], strides = [1, 1]} : vector<2x128xf32> to vector<2x32xf32>
    %15 = arith.negf %14 : vector<2x32xf32>
    %16 = math.exp %15 : vector<2x32xf32>
    %cst_14 = arith.constant 1.000000e+00 : f32
    %17 = vector.broadcast %cst_14 : f32 to vector<2x32xf32>
    %18 = arith.addf %17, %16 : vector<2x32xf32>
    %19 = arith.divf %17, %18 : vector<2x32xf32>
    %20 = vector.extract_strided_slice %13 {offsets = [0, 32], sizes = [2, 32], strides = [1, 1]} : vector<2x128xf32> to vector<2x32xf32>
    %21 = arith.negf %20 : vector<2x32xf32>
    %22 = math.exp %21 : vector<2x32xf32>
    %cst_15 = arith.constant 1.000000e+00 : f32
    %23 = vector.broadcast %cst_15 : f32 to vector<2x32xf32>
    %24 = arith.addf %23, %22 : vector<2x32xf32>
    %25 = arith.divf %23, %24 : vector<2x32xf32>
    %26 = vector.extract_strided_slice %13 {offsets = [0, 64], sizes = [2, 32], strides = [1, 1]} : vector<2x128xf32> to vector<2x32xf32>
    %27 = math.tanh %26 : vector<2x32xf32>
    %28 = vector.extract_strided_slice %13 {offsets = [0, 96], sizes = [2, 32], strides = [1, 1]} : vector<2x128xf32> to vector<2x32xf32>
    %29 = arith.negf %28 : vector<2x32xf32>
    %30 = math.exp %29 : vector<2x32xf32>
    %cst_16 = arith.constant 1.000000e+00 : f32
    %31 = vector.broadcast %cst_16 : f32 to vector<2x32xf32>
    %32 = arith.addf %31, %30 : vector<2x32xf32>
    %33 = arith.divf %31, %32 : vector<2x32xf32>
    %34 = arith.mulf %25, %10 : vector<2x32xf32>
    %35 = arith.mulf %19, %27 : vector<2x32xf32>
    %36 = arith.addf %34, %35 : vector<2x32xf32>
    %37 = math.tanh %36 : vector<2x32xf32>
    %38 = arith.mulf %33, %37 : vector<2x32xf32>
    %c0_17 = arith.constant 0 : index
    %c0_18 = arith.constant 0 : index
    %39 = vector.load %arg14[%c0_17, %c0_18] : memref<16x32xf32, #tpu.memory_space<vmem>>, vector<2x32xf32>
    tpu.vector_store %arg14[%c0_17, %c0_18], %38 {strides = array<i32>} : memref<16x32xf32, #tpu.memory_space<vmem>>, vector<2x32xf32>,
    %40 = vector.extract_strided_slice %6 {offsets = [2, 0], sizes = [2, 128], strides = [1, 1]} : vector<16x128xf32> to vector<2x128xf32>
    %cst_19 = arith.constant dense<0.000000e+00> : vector<2x128xf32>
    %41 = tpu.matmul %38, %1, %cst_19 {dimension_numbers = #tpu.dot_dimension_numbers<[1], [0], [0], [1], [0, 0, 1, 1], [], []>} : vector<2x32xf32>, vector<32x128xf32>, vector<2x128xf32> -> vector<2x128xf32>
    %42 = arith.addf %40, %41 : vector<2x128xf32>
    %43 = vector.extract_strided_slice %42 {offsets = [0, 0], sizes = [2, 32], strides = [1, 1]} : vector<2x128xf32> to vector<2x32xf32>
    %44 = arith.negf %43 : vector<2x32xf32>
    %45 = math.exp %44 : vector<2x32xf32>
    %cst_20 = arith.constant 1.000000e+00 : f32
    %46 = vector.broadcast %cst_20 : f32 to vector<2x32xf32>
    %47 = arith.addf %46, %45 : vector<2x32xf32>
    %48 = arith.divf %46, %47 : vector<2x32xf32>
    %49 = vector.extract_strided_slice %42 {offsets = [0, 32], sizes = [2, 32], strides = [1, 1]} : vector<2x128xf32> to vector<2x32xf32>
    %50 = arith.negf %49 : vector<2x32xf32>
    %51 = math.exp %50 : vector<2x32xf32>
    %cst_21 = arith.constant 1.000000e+00 : f32
    %52 = vector.broadcast %cst_21 : f32 to vector<2x32xf32>
    %53 = arith.addf %52, %51 : vector<2x32xf32>
    %54 = arith.divf %52, %53 : vector<2x32xf32>
    %55 = vector.extract_strided_slice %42 {offsets = [0, 64], sizes = [2, 32], strides = [1, 1]} : vector<2x128xf32> to vector<2x32xf32>
    %56 = math.tanh %55 : vector<2x32xf32>
    %57 = vector.extract_strided_slice %42 {offsets = [0, 96], sizes = [2, 32], strides = [1, 1]} : vector<2x128xf32> to vector<2x32xf32>
    %58 = arith.negf %57 : vector<2x32xf32>
    %59 = math.exp %58 : vector<2x32xf32>
    %cst_22 = arith.constant 1.000000e+00 : f32
    %60 = vector.broadcast %cst_22 : f32 to vector<2x32xf32>
    %61 = arith.addf %60, %59 : vector<2x32xf32>
    %62 = arith.divf %60, %61 : vector<2x32xf32>
    %63 = arith.mulf %54, %36 : vector<2x32xf32>
    %64 = arith.mulf %48, %56 : vector<2x32xf32>
    %65 = arith.addf %63, %64 : vector<2x32xf32>
    %66 = math.tanh %65 : vector<2x32xf32>
    %67 = arith.mulf %62, %66 : vector<2x32xf32>
    %c2 = arith.constant 2 : index
    %c0_23 = arith.constant 0 : index
    %68 = vector.load %arg14[%c2, %c0_23] : memref<16x32xf32, #tpu.memory_space<vmem>>, vector<2x32xf32>
    tpu.vector_store %arg14[%c2, %c0_23], %67 {strides = array<i32>} : memref<16x32xf32, #tpu.memory_space<vmem>>, vector<2x32xf32>,
    %69 = vector.extract_strided_slice %6 {offsets = [4, 0], sizes = [2, 128], strides = [1, 1]} : vector<16x128xf32> to vector<2x128xf32>
    %cst_24 = arith.constant dense<0.000000e+00> : vector<2x128xf32>
    %70 = tpu.matmul %67, %1, %cst_24 {dimension_numbers = #tpu.dot_dimension_numbers<[1], [0], [0], [1], [0, 0, 1, 1], [], []>} : vector<2x32xf32>, vector<32x128xf32>, vector<2x128xf32> -> vector<2x128xf32>
    %71 = arith.addf %69, %70 : vector<2x128xf32>
    %72 = vector.extract_strided_slice %71 {offsets = [0, 0], sizes = [2, 32], strides = [1, 1]} : vector<2x128xf32> to vector<2x32xf32>
    %73 = arith.negf %72 : vector<2x32xf32>
    %74 = math.exp %73 : vector<2x32xf32>
    %cst_25 = arith.constant 1.000000e+00 : f32
    %75 = vector.broadcast %cst_25 : f32 to vector<2x32xf32>
    %76 = arith.addf %75, %74 : vector<2x32xf32>
    %77 = arith.divf %75, %76 : vector<2x32xf32>
    %78 = vector.extract_strided_slice %71 {offsets = [0, 32], sizes = [2, 32], strides = [1, 1]} : vector<2x128xf32> to vector<2x32xf32>
    %79 = arith.negf %78 : vector<2x32xf32>
    %80 = math.exp %79 : vector<2x32xf32>
    %cst_26 = arith.constant 1.000000e+00 : f32
    %81 = vector.broadcast %cst_26 : f32 to vector<2x32xf32>
    %82 = arith.addf %81, %80 : vector<2x32xf32>
    %83 = arith.divf %81, %82 : vector<2x32xf32>
    %84 = vector.extract_strided_slice %71 {offsets = [0, 64], sizes = [2, 32], strides = [1, 1]} : vector<2x128xf32> to vector<2x32xf32>
    %85 = math.tanh %84 : vector<2x32xf32>
    %86 = vector.extract_strided_slice %71 {offsets = [0, 96], sizes = [2, 32], strides = [1, 1]} : vector<2x128xf32> to vector<2x32xf32>
    %87 = arith.negf %86 : vector<2x32xf32>
    %88 = math.exp %87 : vector<2x32xf32>
    %cst_27 = arith.constant 1.000000e+00 : f32
    %89 = vector.broadcast %cst_27 : f32 to vector<2x32xf32>
    %90 = arith.addf %89, %88 : vector<2x32xf32>
    %91 = arith.divf %89, %90 : vector<2x32xf32>
    %92 = arith.mulf %83, %65 : vector<2x32xf32>
    %93 = arith.mulf %77, %85 : vector<2x32xf32>
    %94 = arith.addf %92, %93 : vector<2x32xf32>
    %95 = math.tanh %94 : vector<2x32xf32>
    %96 = arith.mulf %91, %95 : vector<2x32xf32>
    %c4 = arith.constant 4 : index
    %c0_28 = arith.constant 0 : index
    %97 = vector.load %arg14[%c4, %c0_28] : memref<16x32xf32, #tpu.memory_space<vmem>>, vector<2x32xf32>
    tpu.vector_store %arg14[%c4, %c0_28], %96 {strides = array<i32>} : memref<16x32xf32, #tpu.memory_space<vmem>>, vector<2x32xf32>,
    %98 = vector.extract_strided_slice %6 {offsets = [6, 0], sizes = [2, 128], strides = [1, 1]} : vector<16x128xf32> to vector<2x128xf32>
    %cst_29 = arith.constant dense<0.000000e+00> : vector<2x128xf32>
    %99 = tpu.matmul %96, %1, %cst_29 {dimension_numbers = #tpu.dot_dimension_numbers<[1], [0], [0], [1], [0, 0, 1, 1], [], []>} : vector<2x32xf32>, vector<32x128xf32>, vector<2x128xf32> -> vector<2x128xf32>
    %100 = arith.addf %98, %99 : vector<2x128xf32>
    %101 = vector.extract_strided_slice %100 {offsets = [0, 0], sizes = [2, 32], strides = [1, 1]} : vector<2x128xf32> to vector<2x32xf32>
    %102 = arith.negf %101 : vector<2x32xf32>
    %103 = math.exp %102 : vector<2x32xf32>
    %cst_30 = arith.constant 1.000000e+00 : f32
    %104 = vector.broadcast %cst_30 : f32 to vector<2x32xf32>
    %105 = arith.addf %104, %103 : vector<2x32xf32>
    %106 = arith.divf %104, %105 : vector<2x32xf32>
    %107 = vector.extract_strided_slice %100 {offsets = [0, 32], sizes = [2, 32], strides = [1, 1]} : vector<2x128xf32> to vector<2x32xf32>
    %108 = arith.negf %107 : vector<2x32xf32>
    %109 = math.exp %108 : vector<2x32xf32>
    %cst_31 = arith.constant 1.000000e+00 : f32
    %110 = vector.broadcast %cst_31 : f32 to vector<2x32xf32>
    %111 = arith.addf %110, %109 : vector<2x32xf32>
    %112 = arith.divf %110, %111 : vector<2x32xf32>
    %113 = vector.extract_strided_slice %100 {offsets = [0, 64], sizes = [2, 32], strides = [1, 1]} : vector<2x128xf32> to vector<2x32xf32>
    %114 = math.tanh %113 : vector<2x32xf32>
    %115 = vector.extract_strided_slice %100 {offsets = [0, 96], sizes = [2, 32], strides = [1, 1]} : vector<2x128xf32> to vector<2x32xf32>
    %116 = arith.negf %115 : vector<2x32xf32>
    %117 = math.exp %116 : vector<2x32xf32>
    %cst_32 = arith.constant 1.000000e+00 : f32
    %118 = vector.broadcast %cst_32 : f32 to vector<2x32xf32>
    %119 = arith.addf %118, %117 : vector<2x32xf32>
    %120 = arith.divf %118, %119 : vector<2x32xf32>
    %121 = arith.mulf %112, %94 : vector<2x32xf32>
    %122 = arith.mulf %106, %114 : vector<2x32xf32>
    %123 = arith.addf %121, %122 : vector<2x32xf32>
    %124 = math.tanh %123 : vector<2x32xf32>
    %125 = arith.mulf %120, %124 : vector<2x32xf32>
    %c6 = arith.constant 6 : index
    %c0_33 = arith.constant 0 : index
    %126 = vector.load %arg14[%c6, %c0_33] : memref<16x32xf32, #tpu.memory_space<vmem>>, vector<2x32xf32>
    tpu.vector_store %arg14[%c6, %c0_33], %125 {strides = array<i32>} : memref<16x32xf32, #tpu.memory_space<vmem>>, vector<2x32xf32>,
    %127 = vector.extract_strided_slice %6 {offsets = [8, 0], sizes = [2, 128], strides = [1, 1]} : vector<16x128xf32> to vector<2x128xf32>
    %cst_34 = arith.constant dense<0.000000e+00> : vector<2x128xf32>
    %128 = tpu.matmul %125, %1, %cst_34 {dimension_numbers = #tpu.dot_dimension_numbers<[1], [0], [0], [1], [0, 0, 1, 1], [], []>} : vector<2x32xf32>, vector<32x128xf32>, vector<2x128xf32> -> vector<2x128xf32>
    %129 = arith.addf %127, %128 : vector<2x128xf32>
    %130 = vector.extract_strided_slice %129 {offsets = [0, 0], sizes = [2, 32], strides = [1, 1]} : vector<2x128xf32> to vector<2x32xf32>
    %131 = arith.negf %130 : vector<2x32xf32>
    %132 = math.exp %131 : vector<2x32xf32>
    %cst_35 = arith.constant 1.000000e+00 : f32
    %133 = vector.broadcast %cst_35 : f32 to vector<2x32xf32>
    %134 = arith.addf %133, %132 : vector<2x32xf32>
    %135 = arith.divf %133, %134 : vector<2x32xf32>
    %136 = vector.extract_strided_slice %129 {offsets = [0, 32], sizes = [2, 32], strides = [1, 1]} : vector<2x128xf32> to vector<2x32xf32>
    %137 = arith.negf %136 : vector<2x32xf32>
    %138 = math.exp %137 : vector<2x32xf32>
    %cst_36 = arith.constant 1.000000e+00 : f32
    %139 = vector.broadcast %cst_36 : f32 to vector<2x32xf32>
    %140 = arith.addf %139, %138 : vector<2x32xf32>
    %141 = arith.divf %139, %140 : vector<2x32xf32>
    %142 = vector.extract_strided_slice %129 {offsets = [0, 64], sizes = [2, 32], strides = [1, 1]} : vector<2x128xf32> to vector<2x32xf32>
    %143 = math.tanh %142 : vector<2x32xf32>
    %144 = vector.extract_strided_slice %129 {offsets = [0, 96], sizes = [2, 32], strides = [1, 1]} : vector<2x128xf32> to vector<2x32xf32>
    %145 = arith.negf %144 : vector<2x32xf32>
    %146 = math.exp %145 : vector<2x32xf32>
    %cst_37 = arith.constant 1.000000e+00 : f32
    %147 = vector.broadcast %cst_37 : f32 to vector<2x32xf32>
    %148 = arith.addf %147, %146 : vector<2x32xf32>
    %149 = arith.divf %147, %148 : vector<2x32xf32>
    %150 = arith.mulf %141, %123 : vector<2x32xf32>
    %151 = arith.mulf %135, %143 : vector<2x32xf32>
    %152 = arith.addf %150, %151 : vector<2x32xf32>
    %153 = math.tanh %152 : vector<2x32xf32>
    %154 = arith.mulf %149, %153 : vector<2x32xf32>
    %c8 = arith.constant 8 : index
    %c0_38 = arith.constant 0 : index
    %155 = vector.load %arg14[%c8, %c0_38] : memref<16x32xf32, #tpu.memory_space<vmem>>, vector<2x32xf32>
    tpu.vector_store %arg14[%c8, %c0_38], %154 {strides = array<i32>} : memref<16x32xf32, #tpu.memory_space<vmem>>, vector<2x32xf32>,
    %156 = vector.extract_strided_slice %6 {offsets = [10, 0], sizes = [2, 128], strides = [1, 1]} : vector<16x128xf32> to vector<2x128xf32>
    %cst_39 = arith.constant dense<0.000000e+00> : vector<2x128xf32>
    %157 = tpu.matmul %154, %1, %cst_39 {dimension_numbers = #tpu.dot_dimension_numbers<[1], [0], [0], [1], [0, 0, 1, 1], [], []>} : vector<2x32xf32>, vector<32x128xf32>, vector<2x128xf32> -> vector<2x128xf32>
    %158 = arith.addf %156, %157 : vector<2x128xf32>
    %159 = vector.extract_strided_slice %158 {offsets = [0, 0], sizes = [2, 32], strides = [1, 1]} : vector<2x128xf32> to vector<2x32xf32>
    %160 = arith.negf %159 : vector<2x32xf32>
    %161 = math.exp %160 : vector<2x32xf32>
    %cst_40 = arith.constant 1.000000e+00 : f32
    %162 = vector.broadcast %cst_40 : f32 to vector<2x32xf32>
    %163 = arith.addf %162, %161 : vector<2x32xf32>
    %164 = arith.divf %162, %163 : vector<2x32xf32>
    %165 = vector.extract_strided_slice %158 {offsets = [0, 32], sizes = [2, 32], strides = [1, 1]} : vector<2x128xf32> to vector<2x32xf32>
    %166 = arith.negf %165 : vector<2x32xf32>
    %167 = math.exp %166 : vector<2x32xf32>
    %cst_41 = arith.constant 1.000000e+00 : f32
    %168 = vector.broadcast %cst_41 : f32 to vector<2x32xf32>
    %169 = arith.addf %168, %167 : vector<2x32xf32>
    %170 = arith.divf %168, %169 : vector<2x32xf32>
    %171 = vector.extract_strided_slice %158 {offsets = [0, 64], sizes = [2, 32], strides = [1, 1]} : vector<2x128xf32> to vector<2x32xf32>
    %172 = math.tanh %171 : vector<2x32xf32>
    %173 = vector.extract_strided_slice %158 {offsets = [0, 96], sizes = [2, 32], strides = [1, 1]} : vector<2x128xf32> to vector<2x32xf32>
    %174 = arith.negf %173 : vector<2x32xf32>
    %175 = math.exp %174 : vector<2x32xf32>
    %cst_42 = arith.constant 1.000000e+00 : f32
    %176 = vector.broadcast %cst_42 : f32 to vector<2x32xf32>
    %177 = arith.addf %176, %175 : vector<2x32xf32>
    %178 = arith.divf %176, %177 : vector<2x32xf32>
    %179 = arith.mulf %170, %152 : vector<2x32xf32>
    %180 = arith.mulf %164, %172 : vector<2x32xf32>
    %181 = arith.addf %179, %180 : vector<2x32xf32>
    %182 = math.tanh %181 : vector<2x32xf32>
    %183 = arith.mulf %178, %182 : vector<2x32xf32>
    %c10 = arith.constant 10 : index
    %c0_43 = arith.constant 0 : index
    %184 = vector.load %arg14[%c10, %c0_43] : memref<16x32xf32, #tpu.memory_space<vmem>>, vector<2x32xf32>
    tpu.vector_store %arg14[%c10, %c0_43], %183 {strides = array<i32>} : memref<16x32xf32, #tpu.memory_space<vmem>>, vector<2x32xf32>,
    %185 = vector.extract_strided_slice %6 {offsets = [12, 0], sizes = [2, 128], strides = [1, 1]} : vector<16x128xf32> to vector<2x128xf32>
    %cst_44 = arith.constant dense<0.000000e+00> : vector<2x128xf32>
    %186 = tpu.matmul %183, %1, %cst_44 {dimension_numbers = #tpu.dot_dimension_numbers<[1], [0], [0], [1], [0, 0, 1, 1], [], []>} : vector<2x32xf32>, vector<32x128xf32>, vector<2x128xf32> -> vector<2x128xf32>
    %187 = arith.addf %185, %186 : vector<2x128xf32>
    %188 = vector.extract_strided_slice %187 {offsets = [0, 0], sizes = [2, 32], strides = [1, 1]} : vector<2x128xf32> to vector<2x32xf32>
    %189 = arith.negf %188 : vector<2x32xf32>
    %190 = math.exp %189 : vector<2x32xf32>
    %cst_45 = arith.constant 1.000000e+00 : f32
    %191 = vector.broadcast %cst_45 : f32 to vector<2x32xf32>
    %192 = arith.addf %191, %190 : vector<2x32xf32>
    %193 = arith.divf %191, %192 : vector<2x32xf32>
    %194 = vector.extract_strided_slice %187 {offsets = [0, 32], sizes = [2, 32], strides = [1, 1]} : vector<2x128xf32> to vector<2x32xf32>
    %195 = arith.negf %194 : vector<2x32xf32>
    %196 = math.exp %195 : vector<2x32xf32>
    %cst_46 = arith.constant 1.000000e+00 : f32
    %197 = vector.broadcast %cst_46 : f32 to vector<2x32xf32>
    %198 = arith.addf %197, %196 : vector<2x32xf32>
    %199 = arith.divf %197, %198 : vector<2x32xf32>
    %200 = vector.extract_strided_slice %187 {offsets = [0, 64], sizes = [2, 32], strides = [1, 1]} : vector<2x128xf32> to vector<2x32xf32>
    %201 = math.tanh %200 : vector<2x32xf32>
    %202 = vector.extract_strided_slice %187 {offsets = [0, 96], sizes = [2, 32], strides = [1, 1]} : vector<2x128xf32> to vector<2x32xf32>
    %203 = arith.negf %202 : vector<2x32xf32>
    %204 = math.exp %203 : vector<2x32xf32>
    %cst_47 = arith.constant 1.000000e+00 : f32
    %205 = vector.broadcast %cst_47 : f32 to vector<2x32xf32>
    %206 = arith.addf %205, %204 : vector<2x32xf32>
    %207 = arith.divf %205, %206 : vector<2x32xf32>
    %208 = arith.mulf %199, %181 : vector<2x32xf32>
    %209 = arith.mulf %193, %201 : vector<2x32xf32>
    %210 = arith.addf %208, %209 : vector<2x32xf32>
    %211 = math.tanh %210 : vector<2x32xf32>
    %212 = arith.mulf %207, %211 : vector<2x32xf32>
    %c12 = arith.constant 12 : index
    %c0_48 = arith.constant 0 : index
    %213 = vector.load %arg14[%c12, %c0_48] : memref<16x32xf32, #tpu.memory_space<vmem>>, vector<2x32xf32>
    tpu.vector_store %arg14[%c12, %c0_48], %212 {strides = array<i32>} : memref<16x32xf32, #tpu.memory_space<vmem>>, vector<2x32xf32>,
    %214 = vector.extract_strided_slice %6 {offsets = [14, 0], sizes = [2, 128], strides = [1, 1]} : vector<16x128xf32> to vector<2x128xf32>
    %cst_49 = arith.constant dense<0.000000e+00> : vector<2x128xf32>
    %215 = tpu.matmul %212, %1, %cst_49 {dimension_numbers = #tpu.dot_dimension_numbers<[1], [0], [0], [1], [0, 0, 1, 1], [], []>} : vector<2x32xf32>, vector<32x128xf32>, vector<2x128xf32> -> vector<2x128xf32>
    %216 = arith.addf %214, %215 : vector<2x128xf32>
    %217 = vector.extract_strided_slice %216 {offsets = [0, 0], sizes = [2, 32], strides = [1, 1]} : vector<2x128xf32> to vector<2x32xf32>
    %218 = arith.negf %217 : vector<2x32xf32>
    %219 = math.exp %218 : vector<2x32xf32>
    %cst_50 = arith.constant 1.000000e+00 : f32
    %220 = vector.broadcast %cst_50 : f32 to vector<2x32xf32>
    %221 = arith.addf %220, %219 : vector<2x32xf32>
    %222 = arith.divf %220, %221 : vector<2x32xf32>
    %223 = vector.extract_strided_slice %216 {offsets = [0, 32], sizes = [2, 32], strides = [1, 1]} : vector<2x128xf32> to vector<2x32xf32>
    %224 = arith.negf %223 : vector<2x32xf32>
    %225 = math.exp %224 : vector<2x32xf32>
    %cst_51 = arith.constant 1.000000e+00 : f32
    %226 = vector.broadcast %cst_51 : f32 to vector<2x32xf32>
    %227 = arith.addf %226, %225 : vector<2x32xf32>
    %228 = arith.divf %226, %227 : vector<2x32xf32>
    %229 = vector.extract_strided_slice %216 {offsets = [0, 64], sizes = [2, 32], strides = [1, 1]} : vector<2x128xf32> to vector<2x32xf32>
    %230 = math.tanh %229 : vector<2x32xf32>
    %231 = vector.extract_strided_slice %216 {offsets = [0, 96], sizes = [2, 32], strides = [1, 1]} : vector<2x128xf32> to vector<2x32xf32>
    %232 = arith.negf %231 : vector<2x32xf32>
    %233 = math.exp %232 : vector<2x32xf32>
    %cst_52 = arith.constant 1.000000e+00 : f32
    %234 = vector.broadcast %cst_52 : f32 to vector<2x32xf32>
    %235 = arith.addf %234, %233 : vector<2x32xf32>
    %236 = arith.divf %234, %235 : vector<2x32xf32>
    %237 = arith.mulf %228, %210 : vector<2x32xf32>
    %238 = arith.mulf %222, %230 : vector<2x32xf32>
    %239 = arith.addf %237, %238 : vector<2x32xf32>
    %240 = math.tanh %239 : vector<2x32xf32>
    %241 = arith.mulf %236, %240 : vector<2x32xf32>
    %c14 = arith.constant 14 : index
    %c0_53 = arith.constant 0 : index
    %242 = vector.load %arg14[%c14, %c0_53] : memref<16x32xf32, #tpu.memory_space<vmem>>, vector<2x32xf32>
    tpu.vector_store %arg14[%c14, %c0_53], %241 {strides = array<i32>} : memref<16x32xf32, #tpu.memory_space<vmem>>, vector<2x32xf32>,
    %c0_54 = arith.constant 0 : index
    %c0_55 = arith.constant 0 : index
    %c0_56 = arith.constant 0 : index
    %243 = vector.load %arg12[%c0_54, %c0_55, %c0_56] : memref<2x2x32xf32, #tpu.memory_space<vmem>>, vector<1x2x32xf32>
    %244 = vector.shape_cast %243 : vector<1x2x32xf32> to vector<2x32xf32>
    %245 = vector.shape_cast %241 : vector<2x32xf32> to vector<1x2x32xf32>
    tpu.vector_store %arg12[%c0_54, %c0_55, %c0_56], %245 {strides = array<i32>} : memref<2x2x32xf32, #tpu.memory_space<vmem>>, vector<1x2x32xf32>,
    %c0_57 = arith.constant 0 : index
    %c0_58 = arith.constant 0 : index
    %c0_59 = arith.constant 0 : index
    %246 = vector.load %arg13[%c0_57, %c0_58, %c0_59] : memref<2x2x32xf32, #tpu.memory_space<vmem>>, vector<1x2x32xf32>
    %247 = vector.shape_cast %246 : vector<1x2x32xf32> to vector<2x32xf32>
    %248 = vector.shape_cast %239 : vector<2x32xf32> to vector<1x2x32xf32>
    tpu.vector_store %arg13[%c0_57, %c0_58, %c0_59], %248 {strides = array<i32>} : memref<2x2x32xf32, #tpu.memory_space<vmem>>, vector<1x2x32xf32>,
    %c0_60 = arith.constant 0 : index
    %c0_61 = arith.constant 0 : index
    %249 = vector.load %arg6[%c0_60, %c0_61] : memref<32x128xf32, #tpu.memory_space<vmem>>, vector<32x128xf32>
    %c0_62 = arith.constant 0 : index
    %c0_63 = arith.constant 0 : index
    %250 = vector.load %arg7[%c0_62, %c0_63] : memref<32x128xf32, #tpu.memory_space<vmem>>, vector<32x128xf32>
    %c0_64 = arith.constant 0 : index
    %c0_65 = arith.constant 0 : index
    %251 = vector.load %arg8[%c0_64, %c0_65] : memref<1x128xf32, #tpu.memory_space<vmem>>, vector<1x128xf32>
    %c0_66 = arith.constant 0 : index
    %c0_67 = arith.constant 0 : index
    %252 = vector.load %arg14[%c0_66, %c0_67] : memref<16x32xf32, #tpu.memory_space<vmem>>, vector<16x32xf32>
    %cst_68 = arith.constant dense<0.000000e+00> : vector<16x128xf32>
    %253 = tpu.matmul %252, %249, %cst_68 {dimension_numbers = #tpu.dot_dimension_numbers<[1], [0], [0], [1], [0, 0, 1, 1], [], []>} : vector<16x32xf32>, vector<32x128xf32>, vector<16x128xf32> -> vector<16x128xf32>
    %254 = vector.broadcast %251 : vector<1x128xf32> to vector<16x128xf32>
    %255 = arith.addf %253, %254 : vector<16x128xf32>
    %c1 = arith.constant 1 : index
    %c0_69 = arith.constant 0 : index
    %c0_70 = arith.constant 0 : index
    %256 = vector.load %arg1[%c1, %c0_69, %c0_70] : memref<2x2x32xf32, #tpu.memory_space<vmem>>, vector<1x2x32xf32>
    %257 = vector.shape_cast %256 : vector<1x2x32xf32> to vector<2x32xf32>
    %c1_71 = arith.constant 1 : index
    %c0_72 = arith.constant 0 : index
    %c0_73 = arith.constant 0 : index
    %258 = vector.load %arg2[%c1_71, %c0_72, %c0_73] : memref<2x2x32xf32, #tpu.memory_space<vmem>>, vector<1x2x32xf32>
    %259 = vector.shape_cast %258 : vector<1x2x32xf32> to vector<2x32xf32>
    %260 = vector.extract_strided_slice %255 {offsets = [0, 0], sizes = [2, 128], strides = [1, 1]} : vector<16x128xf32> to vector<2x128xf32>
    %cst_74 = arith.constant dense<0.000000e+00> : vector<2x128xf32>
    %261 = tpu.matmul %257, %250, %cst_74 {dimension_numbers = #tpu.dot_dimension_numbers<[1], [0], [0], [1], [0, 0, 1, 1], [], []>} : vector<2x32xf32>, vector<32x128xf32>, vector<2x128xf32> -> vector<2x128xf32>
    %262 = arith.addf %260, %261 : vector<2x128xf32>
    %263 = vector.extract_strided_slice %262 {offsets = [0, 0], sizes = [2, 32], strides = [1, 1]} : vector<2x128xf32> to vector<2x32xf32>
    %264 = arith.negf %263 : vector<2x32xf32>
    %265 = math.exp %264 : vector<2x32xf32>
    %cst_75 = arith.constant 1.000000e+00 : f32
    %266 = vector.broadcast %cst_75 : f32 to vector<2x32xf32>
    %267 = arith.addf %266, %265 : vector<2x32xf32>
    %268 = arith.divf %266, %267 : vector<2x32xf32>
    %269 = vector.extract_strided_slice %262 {offsets = [0, 32], sizes = [2, 32], strides = [1, 1]} : vector<2x128xf32> to vector<2x32xf32>
    %270 = arith.negf %269 : vector<2x32xf32>
    %271 = math.exp %270 : vector<2x32xf32>
    %cst_76 = arith.constant 1.000000e+00 : f32
    %272 = vector.broadcast %cst_76 : f32 to vector<2x32xf32>
    %273 = arith.addf %272, %271 : vector<2x32xf32>
    %274 = arith.divf %272, %273 : vector<2x32xf32>
    %275 = vector.extract_strided_slice %262 {offsets = [0, 64], sizes = [2, 32], strides = [1, 1]} : vector<2x128xf32> to vector<2x32xf32>
    %276 = math.tanh %275 : vector<2x32xf32>
    %277 = vector.extract_strided_slice %262 {offsets = [0, 96], sizes = [2, 32], strides = [1, 1]} : vector<2x128xf32> to vector<2x32xf32>
    %278 = arith.negf %277 : vector<2x32xf32>
    %279 = math.exp %278 : vector<2x32xf32>
    %cst_77 = arith.constant 1.000000e+00 : f32
    %280 = vector.broadcast %cst_77 : f32 to vector<2x32xf32>
    %281 = arith.addf %280, %279 : vector<2x32xf32>
    %282 = arith.divf %280, %281 : vector<2x32xf32>
    %283 = arith.mulf %274, %259 : vector<2x32xf32>
    %284 = arith.mulf %268, %276 : vector<2x32xf32>
    %285 = arith.addf %283, %284 : vector<2x32xf32>
    %286 = math.tanh %285 : vector<2x32xf32>
    %287 = arith.mulf %282, %286 : vector<2x32xf32>
    %c0_78 = arith.constant 0 : index
    %c0_79 = arith.constant 0 : index
    %288 = vector.load %arg15[%c0_78, %c0_79] : memref<16x32xf32, #tpu.memory_space<vmem>>, vector<2x32xf32>
    tpu.vector_store %arg15[%c0_78, %c0_79], %287 {strides = array<i32>} : memref<16x32xf32, #tpu.memory_space<vmem>>, vector<2x32xf32>,
    %289 = vector.extract_strided_slice %255 {offsets = [2, 0], sizes = [2, 128], strides = [1, 1]} : vector<16x128xf32> to vector<2x128xf32>
    %cst_80 = arith.constant dense<0.000000e+00> : vector<2x128xf32>
    %290 = tpu.matmul %287, %250, %cst_80 {dimension_numbers = #tpu.dot_dimension_numbers<[1], [0], [0], [1], [0, 0, 1, 1], [], []>} : vector<2x32xf32>, vector<32x128xf32>, vector<2x128xf32> -> vector<2x128xf32>
    %291 = arith.addf %289, %290 : vector<2x128xf32>
    %292 = vector.extract_strided_slice %291 {offsets = [0, 0], sizes = [2, 32], strides = [1, 1]} : vector<2x128xf32> to vector<2x32xf32>
    %293 = arith.negf %292 : vector<2x32xf32>
    %294 = math.exp %293 : vector<2x32xf32>
    %cst_81 = arith.constant 1.000000e+00 : f32
    %295 = vector.broadcast %cst_81 : f32 to vector<2x32xf32>
    %296 = arith.addf %295, %294 : vector<2x32xf32>
    %297 = arith.divf %295, %296 : vector<2x32xf32>
    %298 = vector.extract_strided_slice %291 {offsets = [0, 32], sizes = [2, 32], strides = [1, 1]} : vector<2x128xf32> to vector<2x32xf32>
    %299 = arith.negf %298 : vector<2x32xf32>
    %300 = math.exp %299 : vector<2x32xf32>
    %cst_82 = arith.constant 1.000000e+00 : f32
    %301 = vector.broadcast %cst_82 : f32 to vector<2x32xf32>
    %302 = arith.addf %301, %300 : vector<2x32xf32>
    %303 = arith.divf %301, %302 : vector<2x32xf32>
    %304 = vector.extract_strided_slice %291 {offsets = [0, 64], sizes = [2, 32], strides = [1, 1]} : vector<2x128xf32> to vector<2x32xf32>
    %305 = math.tanh %304 : vector<2x32xf32>
    %306 = vector.extract_strided_slice %291 {offsets = [0, 96], sizes = [2, 32], strides = [1, 1]} : vector<2x128xf32> to vector<2x32xf32>
    %307 = arith.negf %306 : vector<2x32xf32>
    %308 = math.exp %307 : vector<2x32xf32>
    %cst_83 = arith.constant 1.000000e+00 : f32
    %309 = vector.broadcast %cst_83 : f32 to vector<2x32xf32>
    %310 = arith.addf %309, %308 : vector<2x32xf32>
    %311 = arith.divf %309, %310 : vector<2x32xf32>
    %312 = arith.mulf %303, %285 : vector<2x32xf32>
    %313 = arith.mulf %297, %305 : vector<2x32xf32>
    %314 = arith.addf %312, %313 : vector<2x32xf32>
    %315 = math.tanh %314 : vector<2x32xf32>
    %316 = arith.mulf %311, %315 : vector<2x32xf32>
    %c2_84 = arith.constant 2 : index
    %c0_85 = arith.constant 0 : index
    %317 = vector.load %arg15[%c2_84, %c0_85] : memref<16x32xf32, #tpu.memory_space<vmem>>, vector<2x32xf32>
    tpu.vector_store %arg15[%c2_84, %c0_85], %316 {strides = array<i32>} : memref<16x32xf32, #tpu.memory_space<vmem>>, vector<2x32xf32>,
    %318 = vector.extract_strided_slice %255 {offsets = [4, 0], sizes = [2, 128], strides = [1, 1]} : vector<16x128xf32> to vector<2x128xf32>
    %cst_86 = arith.constant dense<0.000000e+00> : vector<2x128xf32>
    %319 = tpu.matmul %316, %250, %cst_86 {dimension_numbers = #tpu.dot_dimension_numbers<[1], [0], [0], [1], [0, 0, 1, 1], [], []>} : vector<2x32xf32>, vector<32x128xf32>, vector<2x128xf32> -> vector<2x128xf32>
    %320 = arith.addf %318, %319 : vector<2x128xf32>
    %321 = vector.extract_strided_slice %320 {offsets = [0, 0], sizes = [2, 32], strides = [1, 1]} : vector<2x128xf32> to vector<2x32xf32>
    %322 = arith.negf %321 : vector<2x32xf32>
    %323 = math.exp %322 : vector<2x32xf32>
    %cst_87 = arith.constant 1.000000e+00 : f32
    %324 = vector.broadcast %cst_87 : f32 to vector<2x32xf32>
    %325 = arith.addf %324, %323 : vector<2x32xf32>
    %326 = arith.divf %324, %325 : vector<2x32xf32>
    %327 = vector.extract_strided_slice %320 {offsets = [0, 32], sizes = [2, 32], strides = [1, 1]} : vector<2x128xf32> to vector<2x32xf32>
    %328 = arith.negf %327 : vector<2x32xf32>
    %329 = math.exp %328 : vector<2x32xf32>
    %cst_88 = arith.constant 1.000000e+00 : f32
    %330 = vector.broadcast %cst_88 : f32 to vector<2x32xf32>
    %331 = arith.addf %330, %329 : vector<2x32xf32>
    %332 = arith.divf %330, %331 : vector<2x32xf32>
    %333 = vector.extract_strided_slice %320 {offsets = [0, 64], sizes = [2, 32], strides = [1, 1]} : vector<2x128xf32> to vector<2x32xf32>
    %334 = math.tanh %333 : vector<2x32xf32>
    %335 = vector.extract_strided_slice %320 {offsets = [0, 96], sizes = [2, 32], strides = [1, 1]} : vector<2x128xf32> to vector<2x32xf32>
    %336 = arith.negf %335 : vector<2x32xf32>
    %337 = math.exp %336 : vector<2x32xf32>
    %cst_89 = arith.constant 1.000000e+00 : f32
    %338 = vector.broadcast %cst_89 : f32 to vector<2x32xf32>
    %339 = arith.addf %338, %337 : vector<2x32xf32>
    %340 = arith.divf %338, %339 : vector<2x32xf32>
    %341 = arith.mulf %332, %314 : vector<2x32xf32>
    %342 = arith.mulf %326, %334 : vector<2x32xf32>
    %343 = arith.addf %341, %342 : vector<2x32xf32>
    %344 = math.tanh %343 : vector<2x32xf32>
    %345 = arith.mulf %340, %344 : vector<2x32xf32>
    %c4_90 = arith.constant 4 : index
    %c0_91 = arith.constant 0 : index
    %346 = vector.load %arg15[%c4_90, %c0_91] : memref<16x32xf32, #tpu.memory_space<vmem>>, vector<2x32xf32>
    tpu.vector_store %arg15[%c4_90, %c0_91], %345 {strides = array<i32>} : memref<16x32xf32, #tpu.memory_space<vmem>>, vector<2x32xf32>,
    %347 = vector.extract_strided_slice %255 {offsets = [6, 0], sizes = [2, 128], strides = [1, 1]} : vector<16x128xf32> to vector<2x128xf32>
    %cst_92 = arith.constant dense<0.000000e+00> : vector<2x128xf32>
    %348 = tpu.matmul %345, %250, %cst_92 {dimension_numbers = #tpu.dot_dimension_numbers<[1], [0], [0], [1], [0, 0, 1, 1], [], []>} : vector<2x32xf32>, vector<32x128xf32>, vector<2x128xf32> -> vector<2x128xf32>
    %349 = arith.addf %347, %348 : vector<2x128xf32>
    %350 = vector.extract_strided_slice %349 {offsets = [0, 0], sizes = [2, 32], strides = [1, 1]} : vector<2x128xf32> to vector<2x32xf32>
    %351 = arith.negf %350 : vector<2x32xf32>
    %352 = math.exp %351 : vector<2x32xf32>
    %cst_93 = arith.constant 1.000000e+00 : f32
    %353 = vector.broadcast %cst_93 : f32 to vector<2x32xf32>
    %354 = arith.addf %353, %352 : vector<2x32xf32>
    %355 = arith.divf %353, %354 : vector<2x32xf32>
    %356 = vector.extract_strided_slice %349 {offsets = [0, 32], sizes = [2, 32], strides = [1, 1]} : vector<2x128xf32> to vector<2x32xf32>
    %357 = arith.negf %356 : vector<2x32xf32>
    %358 = math.exp %357 : vector<2x32xf32>
    %cst_94 = arith.constant 1.000000e+00 : f32
    %359 = vector.broadcast %cst_94 : f32 to vector<2x32xf32>
    %360 = arith.addf %359, %358 : vector<2x32xf32>
    %361 = arith.divf %359, %360 : vector<2x32xf32>
    %362 = vector.extract_strided_slice %349 {offsets = [0, 64], sizes = [2, 32], strides = [1, 1]} : vector<2x128xf32> to vector<2x32xf32>
    %363 = math.tanh %362 : vector<2x32xf32>
    %364 = vector.extract_strided_slice %349 {offsets = [0, 96], sizes = [2, 32], strides = [1, 1]} : vector<2x128xf32> to vector<2x32xf32>
    %365 = arith.negf %364 : vector<2x32xf32>
    %366 = math.exp %365 : vector<2x32xf32>
    %cst_95 = arith.constant 1.000000e+00 : f32
    %367 = vector.broadcast %cst_95 : f32 to vector<2x32xf32>
    %368 = arith.addf %367, %366 : vector<2x32xf32>
    %369 = arith.divf %367, %368 : vector<2x32xf32>
    %370 = arith.mulf %361, %343 : vector<2x32xf32>
    %371 = arith.mulf %355, %363 : vector<2x32xf32>
    %372 = arith.addf %370, %371 : vector<2x32xf32>
    %373 = math.tanh %372 : vector<2x32xf32>
    %374 = arith.mulf %369, %373 : vector<2x32xf32>
    %c6_96 = arith.constant 6 : index
    %c0_97 = arith.constant 0 : index
    %375 = vector.load %arg15[%c6_96, %c0_97] : memref<16x32xf32, #tpu.memory_space<vmem>>, vector<2x32xf32>
    tpu.vector_store %arg15[%c6_96, %c0_97], %374 {strides = array<i32>} : memref<16x32xf32, #tpu.memory_space<vmem>>, vector<2x32xf32>,
    %376 = vector.extract_strided_slice %255 {offsets = [8, 0], sizes = [2, 128], strides = [1, 1]} : vector<16x128xf32> to vector<2x128xf32>
    %cst_98 = arith.constant dense<0.000000e+00> : vector<2x128xf32>
    %377 = tpu.matmul %374, %250, %cst_98 {dimension_numbers = #tpu.dot_dimension_numbers<[1], [0], [0], [1], [0, 0, 1, 1], [], []>} : vector<2x32xf32>, vector<32x128xf32>, vector<2x128xf32> -> vector<2x128xf32>
    %378 = arith.addf %376, %377 : vector<2x128xf32>
    %379 = vector.extract_strided_slice %378 {offsets = [0, 0], sizes = [2, 32], strides = [1, 1]} : vector<2x128xf32> to vector<2x32xf32>
    %380 = arith.negf %379 : vector<2x32xf32>
    %381 = math.exp %380 : vector<2x32xf32>
    %cst_99 = arith.constant 1.000000e+00 : f32
    %382 = vector.broadcast %cst_99 : f32 to vector<2x32xf32>
    %383 = arith.addf %382, %381 : vector<2x32xf32>
    %384 = arith.divf %382, %383 : vector<2x32xf32>
    %385 = vector.extract_strided_slice %378 {offsets = [0, 32], sizes = [2, 32], strides = [1, 1]} : vector<2x128xf32> to vector<2x32xf32>
    %386 = arith.negf %385 : vector<2x32xf32>
    %387 = math.exp %386 : vector<2x32xf32>
    %cst_100 = arith.constant 1.000000e+00 : f32
    %388 = vector.broadcast %cst_100 : f32 to vector<2x32xf32>
    %389 = arith.addf %388, %387 : vector<2x32xf32>
    %390 = arith.divf %388, %389 : vector<2x32xf32>
    %391 = vector.extract_strided_slice %378 {offsets = [0, 64], sizes = [2, 32], strides = [1, 1]} : vector<2x128xf32> to vector<2x32xf32>
    %392 = math.tanh %391 : vector<2x32xf32>
    %393 = vector.extract_strided_slice %378 {offsets = [0, 96], sizes = [2, 32], strides = [1, 1]} : vector<2x128xf32> to vector<2x32xf32>
    %394 = arith.negf %393 : vector<2x32xf32>
    %395 = math.exp %394 : vector<2x32xf32>
    %cst_101 = arith.constant 1.000000e+00 : f32
    %396 = vector.broadcast %cst_101 : f32 to vector<2x32xf32>
    %397 = arith.addf %396, %395 : vector<2x32xf32>
    %398 = arith.divf %396, %397 : vector<2x32xf32>
    %399 = arith.mulf %390, %372 : vector<2x32xf32>
    %400 = arith.mulf %384, %392 : vector<2x32xf32>
    %401 = arith.addf %399, %400 : vector<2x32xf32>
    %402 = math.tanh %401 : vector<2x32xf32>
    %403 = arith.mulf %398, %402 : vector<2x32xf32>
    %c8_102 = arith.constant 8 : index
    %c0_103 = arith.constant 0 : index
    %404 = vector.load %arg15[%c8_102, %c0_103] : memref<16x32xf32, #tpu.memory_space<vmem>>, vector<2x32xf32>
    tpu.vector_store %arg15[%c8_102, %c0_103], %403 {strides = array<i32>} : memref<16x32xf32, #tpu.memory_space<vmem>>, vector<2x32xf32>,
    %405 = vector.extract_strided_slice %255 {offsets = [10, 0], sizes = [2, 128], strides = [1, 1]} : vector<16x128xf32> to vector<2x128xf32>
    %cst_104 = arith.constant dense<0.000000e+00> : vector<2x128xf32>
    %406 = tpu.matmul %403, %250, %cst_104 {dimension_numbers = #tpu.dot_dimension_numbers<[1], [0], [0], [1], [0, 0, 1, 1], [], []>} : vector<2x32xf32>, vector<32x128xf32>, vector<2x128xf32> -> vector<2x128xf32>
    %407 = arith.addf %405, %406 : vector<2x128xf32>
    %408 = vector.extract_strided_slice %407 {offsets = [0, 0], sizes = [2, 32], strides = [1, 1]} : vector<2x128xf32> to vector<2x32xf32>
    %409 = arith.negf %408 : vector<2x32xf32>
    %410 = math.exp %409 : vector<2x32xf32>
    %cst_105 = arith.constant 1.000000e+00 : f32
    %411 = vector.broadcast %cst_105 : f32 to vector<2x32xf32>
    %412 = arith.addf %411, %410 : vector<2x32xf32>
    %413 = arith.divf %411, %412 : vector<2x32xf32>
    %414 = vector.extract_strided_slice %407 {offsets = [0, 32], sizes = [2, 32], strides = [1, 1]} : vector<2x128xf32> to vector<2x32xf32>
    %415 = arith.negf %414 : vector<2x32xf32>
    %416 = math.exp %415 : vector<2x32xf32>
    %cst_106 = arith.constant 1.000000e+00 : f32
    %417 = vector.broadcast %cst_106 : f32 to vector<2x32xf32>
    %418 = arith.addf %417, %416 : vector<2x32xf32>
    %419 = arith.divf %417, %418 : vector<2x32xf32>
    %420 = vector.extract_strided_slice %407 {offsets = [0, 64], sizes = [2, 32], strides = [1, 1]} : vector<2x128xf32> to vector<2x32xf32>
    %421 = math.tanh %420 : vector<2x32xf32>
    %422 = vector.extract_strided_slice %407 {offsets = [0, 96], sizes = [2, 32], strides = [1, 1]} : vector<2x128xf32> to vector<2x32xf32>
    %423 = arith.negf %422 : vector<2x32xf32>
    %424 = math.exp %423 : vector<2x32xf32>
    %cst_107 = arith.constant 1.000000e+00 : f32
    %425 = vector.broadcast %cst_107 : f32 to vector<2x32xf32>
    %426 = arith.addf %425, %424 : vector<2x32xf32>
    %427 = arith.divf %425, %426 : vector<2x32xf32>
    %428 = arith.mulf %419, %401 : vector<2x32xf32>
    %429 = arith.mulf %413, %421 : vector<2x32xf32>
    %430 = arith.addf %428, %429 : vector<2x32xf32>
    %431 = math.tanh %430 : vector<2x32xf32>
    %432 = arith.mulf %427, %431 : vector<2x32xf32>
    %c10_108 = arith.constant 10 : index
    %c0_109 = arith.constant 0 : index
    %433 = vector.load %arg15[%c10_108, %c0_109] : memref<16x32xf32, #tpu.memory_space<vmem>>, vector<2x32xf32>
    tpu.vector_store %arg15[%c10_108, %c0_109], %432 {strides = array<i32>} : memref<16x32xf32, #tpu.memory_space<vmem>>, vector<2x32xf32>,
    %434 = vector.extract_strided_slice %255 {offsets = [12, 0], sizes = [2, 128], strides = [1, 1]} : vector<16x128xf32> to vector<2x128xf32>
    %cst_110 = arith.constant dense<0.000000e+00> : vector<2x128xf32>
    %435 = tpu.matmul %432, %250, %cst_110 {dimension_numbers = #tpu.dot_dimension_numbers<[1], [0], [0], [1], [0, 0, 1, 1], [], []>} : vector<2x32xf32>, vector<32x128xf32>, vector<2x128xf32> -> vector<2x128xf32>
    %436 = arith.addf %434, %435 : vector<2x128xf32>
    %437 = vector.extract_strided_slice %436 {offsets = [0, 0], sizes = [2, 32], strides = [1, 1]} : vector<2x128xf32> to vector<2x32xf32>
    %438 = arith.negf %437 : vector<2x32xf32>
    %439 = math.exp %438 : vector<2x32xf32>
    %cst_111 = arith.constant 1.000000e+00 : f32
    %440 = vector.broadcast %cst_111 : f32 to vector<2x32xf32>
    %441 = arith.addf %440, %439 : vector<2x32xf32>
    %442 = arith.divf %440, %441 : vector<2x32xf32>
    %443 = vector.extract_strided_slice %436 {offsets = [0, 32], sizes = [2, 32], strides = [1, 1]} : vector<2x128xf32> to vector<2x32xf32>
    %444 = arith.negf %443 : vector<2x32xf32>
    %445 = math.exp %444 : vector<2x32xf32>
    %cst_112 = arith.constant 1.000000e+00 : f32
    %446 = vector.broadcast %cst_112 : f32 to vector<2x32xf32>
    %447 = arith.addf %446, %445 : vector<2x32xf32>
    %448 = arith.divf %446, %447 : vector<2x32xf32>
    %449 = vector.extract_strided_slice %436 {offsets = [0, 64], sizes = [2, 32], strides = [1, 1]} : vector<2x128xf32> to vector<2x32xf32>
    %450 = math.tanh %449 : vector<2x32xf32>
    %451 = vector.extract_strided_slice %436 {offsets = [0, 96], sizes = [2, 32], strides = [1, 1]} : vector<2x128xf32> to vector<2x32xf32>
    %452 = arith.negf %451 : vector<2x32xf32>
    %453 = math.exp %452 : vector<2x32xf32>
    %cst_113 = arith.constant 1.000000e+00 : f32
    %454 = vector.broadcast %cst_113 : f32 to vector<2x32xf32>
    %455 = arith.addf %454, %453 : vector<2x32xf32>
    %456 = arith.divf %454, %455 : vector<2x32xf32>
    %457 = arith.mulf %448, %430 : vector<2x32xf32>
    %458 = arith.mulf %442, %450 : vector<2x32xf32>
    %459 = arith.addf %457, %458 : vector<2x32xf32>
    %460 = math.tanh %459 : vector<2x32xf32>
    %461 = arith.mulf %456, %460 : vector<2x32xf32>
    %c12_114 = arith.constant 12 : index
    %c0_115 = arith.constant 0 : index
    %462 = vector.load %arg15[%c12_114, %c0_115] : memref<16x32xf32, #tpu.memory_space<vmem>>, vector<2x32xf32>
    tpu.vector_store %arg15[%c12_114, %c0_115], %461 {strides = array<i32>} : memref<16x32xf32, #tpu.memory_space<vmem>>, vector<2x32xf32>,
    %463 = vector.extract_strided_slice %255 {offsets = [14, 0], sizes = [2, 128], strides = [1, 1]} : vector<16x128xf32> to vector<2x128xf32>
    %cst_116 = arith.constant dense<0.000000e+00> : vector<2x128xf32>
    %464 = tpu.matmul %461, %250, %cst_116 {dimension_numbers = #tpu.dot_dimension_numbers<[1], [0], [0], [1], [0, 0, 1, 1], [], []>} : vector<2x32xf32>, vector<32x128xf32>, vector<2x128xf32> -> vector<2x128xf32>
    %465 = arith.addf %463, %464 : vector<2x128xf32>
    %466 = vector.extract_strided_slice %465 {offsets = [0, 0], sizes = [2, 32], strides = [1, 1]} : vector<2x128xf32> to vector<2x32xf32>
    %467 = arith.negf %466 : vector<2x32xf32>
    %468 = math.exp %467 : vector<2x32xf32>
    %cst_117 = arith.constant 1.000000e+00 : f32
    %469 = vector.broadcast %cst_117 : f32 to vector<2x32xf32>
    %470 = arith.addf %469, %468 : vector<2x32xf32>
    %471 = arith.divf %469, %470 : vector<2x32xf32>
    %472 = vector.extract_strided_slice %465 {offsets = [0, 32], sizes = [2, 32], strides = [1, 1]} : vector<2x128xf32> to vector<2x32xf32>
    %473 = arith.negf %472 : vector<2x32xf32>
    %474 = math.exp %473 : vector<2x32xf32>
    %cst_118 = arith.constant 1.000000e+00 : f32
    %475 = vector.broadcast %cst_118 : f32 to vector<2x32xf32>
    %476 = arith.addf %475, %474 : vector<2x32xf32>
    %477 = arith.divf %475, %476 : vector<2x32xf32>
    %478 = vector.extract_strided_slice %465 {offsets = [0, 64], sizes = [2, 32], strides = [1, 1]} : vector<2x128xf32> to vector<2x32xf32>
    %479 = math.tanh %478 : vector<2x32xf32>
    %480 = vector.extract_strided_slice %465 {offsets = [0, 96], sizes = [2, 32], strides = [1, 1]} : vector<2x128xf32> to vector<2x32xf32>
    %481 = arith.negf %480 : vector<2x32xf32>
    %482 = math.exp %481 : vector<2x32xf32>
    %cst_119 = arith.constant 1.000000e+00 : f32
    %483 = vector.broadcast %cst_119 : f32 to vector<2x32xf32>
    %484 = arith.addf %483, %482 : vector<2x32xf32>
    %485 = arith.divf %483, %484 : vector<2x32xf32>
    %486 = arith.mulf %477, %459 : vector<2x32xf32>
    %487 = arith.mulf %471, %479 : vector<2x32xf32>
    %488 = arith.addf %486, %487 : vector<2x32xf32>
    %489 = math.tanh %488 : vector<2x32xf32>
    %490 = arith.mulf %485, %489 : vector<2x32xf32>
    %c14_120 = arith.constant 14 : index
    %c0_121 = arith.constant 0 : index
    %491 = vector.load %arg15[%c14_120, %c0_121] : memref<16x32xf32, #tpu.memory_space<vmem>>, vector<2x32xf32>
    tpu.vector_store %arg15[%c14_120, %c0_121], %490 {strides = array<i32>} : memref<16x32xf32, #tpu.memory_space<vmem>>, vector<2x32xf32>,
    %c1_122 = arith.constant 1 : index
    %c0_123 = arith.constant 0 : index
    %c0_124 = arith.constant 0 : index
    %492 = vector.load %arg12[%c1_122, %c0_123, %c0_124] : memref<2x2x32xf32, #tpu.memory_space<vmem>>, vector<1x2x32xf32>
    %493 = vector.shape_cast %492 : vector<1x2x32xf32> to vector<2x32xf32>
    %494 = vector.shape_cast %490 : vector<2x32xf32> to vector<1x2x32xf32>
    tpu.vector_store %arg12[%c1_122, %c0_123, %c0_124], %494 {strides = array<i32>} : memref<2x2x32xf32, #tpu.memory_space<vmem>>, vector<1x2x32xf32>,
    %c1_125 = arith.constant 1 : index
    %c0_126 = arith.constant 0 : index
    %c0_127 = arith.constant 0 : index
    %495 = vector.load %arg13[%c1_125, %c0_126, %c0_127] : memref<2x2x32xf32, #tpu.memory_space<vmem>>, vector<1x2x32xf32>
    %496 = vector.shape_cast %495 : vector<1x2x32xf32> to vector<2x32xf32>
    %497 = vector.shape_cast %488 : vector<2x32xf32> to vector<1x2x32xf32>
    tpu.vector_store %arg13[%c1_125, %c0_126, %c0_127], %497 {strides = array<i32>} : memref<2x2x32xf32, #tpu.memory_space<vmem>>, vector<1x2x32xf32>,
    %c0_128 = arith.constant 0 : index
    %c0_129 = arith.constant 0 : index
    %498 = vector.load %arg15[%c0_128, %c0_129] : memref<16x32xf32, #tpu.memory_space<vmem>>, vector<16x32xf32>
    %c0_130 = arith.constant 0 : index
    %c0_131 = arith.constant 0 : index
    %499 = vector.load %arg9[%c0_130, %c0_131] : memref<32x64xf32, #tpu.memory_space<vmem>>, vector<32x64xf32>
    %cst_132 = arith.constant dense<0.000000e+00> : vector<16x64xf32>
    %500 = tpu.matmul %498, %499, %cst_132 {dimension_numbers = #tpu.dot_dimension_numbers<[1], [0], [0], [1], [0, 0, 1, 1], [], []>} : vector<16x32xf32>, vector<32x64xf32>, vector<16x64xf32> -> vector<16x64xf32>
    %c0_133 = arith.constant 0 : index
    %c0_134 = arith.constant 0 : index
    %501 = vector.load %arg10[%c0_133, %c0_134] : memref<1x64xf32, #tpu.memory_space<vmem>>, vector<1x64xf32>
    %502 = vector.broadcast %501 : vector<1x64xf32> to vector<16x64xf32>
    %503 = arith.addf %500, %502 : vector<16x64xf32>
    %c0_135 = arith.constant 0 : index
    %c0_136 = arith.constant 0 : index
    %504 = vector.load %arg11[%c0_135, %c0_136] : memref<16x64xf32, #tpu.memory_space<vmem>>, vector<16x64xf32>
    tpu.vector_store %arg11[%c0_135, %c0_136], %503 {strides = array<i32>} : memref<16x64xf32, #tpu.memory_space<vmem>>, vector<16x64xf32>,
    return
  }
}

</mosaic_0001>

<bundles_post_ra>
// kernel: lstm_word2vec_forward.1
= control target key start
LH: loop header
LB: loop body
LE: loop exit
PB: predicated region body
PF: predicated region fallthrough
CT: control target
= control target key end

     0   :  { %19 = vsyncpa [#allocation5], 0  ;;  %vm58_vm0 = vcmask 130048   ;;  %v2791_v3 = vmov 0.0|0.0   ;;  %vm2792_vm1 = vmmov 0   ;;  %v2793_v10 = vmov 0.0   ;;  %s3269_s0 = inlined_call_operand.vmem [shape: f32[16,16], index: 0, kind: input, shape index: {}]   ;;  %s3270_s1 = inlined_call_operand.vmem [shape: f32[2,2,32], index: 1, kind: input, shape index: {}]   ;;  %s3271_s2 = inlined_call_operand.vmem [shape: f32[2,2,32], index: 2, kind: input, shape index: {}]   ;;  %s3272_s3 = inlined_call_operand.vmem [shape: f32[16,128], index: 3, kind: input, shape index: {}]   ;;  %s3273_s4 = inlined_call_operand.vmem [shape: f32[32,128], index: 4, kind: input, shape index: {}]   ;;  %s3274_s5 = inlined_call_operand.vmem [shape: f32[1,128], index: 5, kind: input, shape index: {}]   ;;  %s3275_s6 = inlined_call_operand.vmem [shape: f32[32,128], index: 6, kind: input, shape index: {}]   ;;  %s3276_s7 = inlined_call_operand.vmem [shape: f32[32,128], index: 7, kind: input, shape index: {}]   ;;  %s3277_s8 = inlined_call_operand.vmem [shape: f32[1,128], index: 8, kind: input, shape index: {}]   ;;  %s3278_s9 = inlined_call_operand.vmem [shape: f32[32,64], index: 9, kind: input, shape index: {}]   ;;  %s3279_s10 = inlined_call_operand.vmem [shape: f32[1,64], index: 10, kind: input, shape index: {}]   ;;  %s3280_s11 = inlined_call_operand.vmem [shape: f32[16,64], index: 11, kind: output, shape index: {0}]   ;;  %s3281_s12 = inlined_call_operand.hbm [shape: f32[2,2,32], index: 12, kind: output, shape index: {1}]   ;;  %s3282_s13 = inlined_call_operand.hbm [shape: f32[2,2,32], index: 13, kind: output, shape index: {2}]  }
   0x1   :  { %v43_v0 = vld [vmem:[%s3272_s3] sm:$0xff]  ;;  %v44_v1 = vld [vmem:[%s3272_s3 + $0x8] sm:$0xff]  ;;  %2494 = vmatprep.subr.bf16.mxu1 %v2791_v3  ;;  %v47_v8 = vld [vmem:[%s3273_s4 + $0x10] sm:$0xff]  ;;  %2300 = vmatprep.mubr.msk.f32.mxu1 %vm2792_vm1, %v2793_v10 }
   0x2   :  { %v45_v2 = vld [vmem:[%s3273_s4] sm:$0xff]  ;;  %v2490_v4 = vpack.c.bf16 %v44_v1, %v43_v0  ;;  %v46_v5 = vld [vmem:[%s3273_s4 + $0x8] sm:$0xff]  ;;  %v48_v9 = vld [vmem:[%s3273_s4 + $0x18] sm:$0xff] }
   0x3   :  { %v50_v6 = vld [vmem:[%s3269_s0] sm:$0xff]  ;;  %v2886_v7 = vpack.c.bf16 %v46_v5, %v45_v2 }
   0x4   :  { %2289 = vmatprep.mubr.msk.f32.mxu0 %vm58_vm0, %v50_v6  ;;  %2491 = vmatprep.subr.bf16.mxu0 %v2490_v4 }
   0x5   :  { %20 = vsyncpa [#allocation7], 0  ;;  %2496 = vmatpush3.bf16.msra.mxu1 %v2886_v7  ;;  %2493 = vmatpush3.bf16.msra.mxu0 %v2490_v4  ;;  %v51_v11 = vld [vmem:[%s3269_s0 + $0x8] sm:$0xff]  ;;  %v2901_v12 = vpack.c.bf16 %v48_v9, %v47_v8  ;;  %v140_v13 = vld [vmem:[%s3270_s1] sm:$0x3]  ;;  %vm142_vm2 = vcmask 261120  }
   0x6   :  { %2497 = vmatprep.subr.bf16.mxu1 %v2791_v3  ;;  %2500 = vmatprep.subr.bf16.mxu0 %v2791_v3  ;;  %v2146_v14 = vld [vmem:[%s3274_s5] ss:$0 sm:$0xff]  ;;  %s2794_s25 = smov 64   ;;  %s2795_s5 = smov 32   ;;  %vm249_vm3 = vcmask 254976   ;;  %vm358_vm4 = vcmask 257026  }
   0x7   :  { %v141_v23 = vld [vmem:[%s3271_s2] sm:$0x3]  ;;  %vm582_vm5 = vcmask 261126   ;;  %vm470_vm6 = vcmask 259076   ;;  %s2798_s3 = smov [#allocation6]  }
   0x8   :  { %2290 = vmatmul.mubr.msk.f32.vlgmr.msra.gmra.mrb[0].mxu0 %vm58_vm0, %v51_v11  ;;  %s2129_s18 = sshll.u32 %s2798_s3, 4  ;;  %s2130_s18 = int_to_ptr.vmem [resolvable:$true] %s2129_s18 }
   0x9   :  { %2499 = vmatpush3.bf16.msra.mxu1 %v2901_v12  ;;  %2502 = vmatpush3.bf16.msra.mxu0 %v2886_v7 }
   0xa   :  { %2503 = vmatprep.subr.bf16.mxu0 %v2791_v3  ;;  %2311 = vmatprep.mubr.msk.f32.mxu0 %vm2792_vm1, %v2793_v10 }
   0xb   :  { %2506 = vmatprep.subr.bf16.mxu1 %v2791_v3 }
   0xc   :  { %2301 = vmatmul.mubr.msk.f32.vlgmr.msra.gmra.mrb[0].mxu1 %vm142_vm2, %v140_v13 }
   0xd   :  { %2505 = vmatpush3.bf16.msra.mxu0 %v2901_v12  ;;  %2508 = vmatpush3.bf16.msra.mxu1 %v2886_v7 }
   0xe   :  { %2509 = vmatprep.subr.bf16.mxu1 %v2791_v3  ;;  %2322 = vmatprep.mubr.msk.f32.mxu1 %vm2792_vm1, %v2793_v10 }
   0xf   :  { %2512 = vmatprep.subr.bf16.mxu0 %v2791_v3 }
  0x11   :  { %2511 = vmatpush3.bf16.msra.mxu1 %v2901_v12 }
  0x12   :  { %2518 = vmatprep.subr.bf16.mxu1 %v2791_v3 }
  0xdb   :  { %v2291_v15 = vpop.f32.mrb[0].mxu0 }
  0xdc   :  { %v2927_v16 = vadd.f32 %v2291_v15, %v2146_v14  ;;  %v131_v17 = vpop.f32.mrb[1].mxu0 }
  0xdd   :  { %v2929_v18 = vadd.f32 %v2146_v14, %v131_v17 }
  0xdf   :  { %v212_v19 = vpop.f32.mrb[0].mxu1 }
  0xe0   :  { %v216_v20 = vadd.f32 %v212_v19, %v2929_v18  ;;  %v2302_v21 = vpop.f32.mrb[1].mxu1 }
  0xe2   :  { %2615 = vtanh.f32 %v216_v20  ;;  %v2150_v24 = vmul.f32 -1.442695, %v216_v20 }
  0xe4   :  { %2617 = vpow2.f32 %v2150_v24 }
  0xec   :  { %v2616_v22 = vpop.eup %2615 }
  0xed   :  { %230 = vrot.lane.b32.xlu0 %v2616_v22, %s2794_s25 }
  0xee   :  { %v2618_v25 = vpop.eup %2617 }
  0xef   :  { %v220_v26 = vadd.f32 1.0, %v2618_v25 }
  0xf1   :  { %225 = vrot.lane.b32.xlu0 %v141_v23, %s2795_s5  ;;  %2619 = vrcp.f32 %v220_v26 }
  0xfb   :  { %v2620_v27 = vpop.eup %2619 }
 0x15f   :  { %v231_v28 = vpop.permute.xlu0 %230 }
 0x160   :  { %v233_v29 = vmul.f32 %v2620_v27, %v231_v28 }
 0x162   :  { %235 = vrot.lane.b32.xlu1 %v233_v29, %s2795_s5 }
 0x163   :  { %v226_v30 = vpop.permute.xlu0 %225 }
 0x164   :  { %v228_v31 = vmul.f32 %v2620_v27, %v226_v30 }
 0x1d4   :  { %v236_v32 = vpop.permute.xlu1 %235 }
 0x1d5   :  { %v238_v33 = vadd.f32 %v236_v32, %v228_v31 }
 0x1d7   :  { %2621 = vtanh.f32 %v238_v33  ;;  %v335_v49 = vrot.slane %v238_v33, 6 }
 0x1e1   :  { %v2622_v34 = vpop.eup %2621 }
 0x1e2   :  { %241 = vrot.lane.b32.xlu1 %v2622_v34, %s2794_s25 }
 0x254   :  { %v242_v35 = vpop.permute.xlu1 %241 }
 0x255   :  { %v244_v36 = vmul.f32 %v2620_v27, %v242_v35 }
 0x257   :  { %246 = vrot.lane.b32.xlu0 %v244_v36, %s2795_s5 }
 0x2c9   :  { %v247_v37 = vpop.permute.xlu0 %246 }
 0x2ca   :  { %250 = vst.msk [vmem:[#allocation2] sm:$0x3] %vm249_vm3, %v247_v37  ;;  %2312 = vmatmul.mubr.msk.f32.vlgmr.msra.gmra.mrb[2].mxu0 %vm142_vm2, %v247_v37 }
 0x2cb   :  { %2514 = vmatpush3.bf16.msra.mxu0 %v2886_v7  ;;  %2333 = vmatprep.mubr.msk.f32.mxu0 %vm2792_vm1, %v2793_v10 }
 0x2cc   :  { %2515 = vmatprep.subr.bf16.mxu0 %v2791_v3 }
 0x2cf   :  { %2517 = vmatpush3.bf16.msra.mxu0 %v2901_v12 }
 0x2d0   :  { %2524 = vmatprep.subr.bf16.mxu0 %v2791_v3 }
 0x39d   :  { %v319_v38 = vpop.f32.mrb[2].mxu0 }
 0x39e   :  { %v324_v39 = vrot.slane %v319_v38, 6  ;;  %v2313_v40 = vpop.f32.mrb[3].mxu0 }
 0x3a0   :  { %v326_v41 = vadd.f32 %v324_v39, %v2929_v18 }
 0x3a2   :  { %2623 = vtanh.f32 %v326_v41  ;;  %v2152_v43 = vmul.f32 -1.442695, %v326_v41 }
 0x3a4   :  { %2625 = vpow2.f32 %v2152_v43 }
 0x3ac   :  { %v2624_v42 = vpop.eup %2623 }
 0x3ad   :  { %339 = vrot.lane.b32.xlu1 %v2624_v42, %s2794_s25 }
 0x3ae   :  { %v2626_v44 = vpop.eup %2625 }
 0x3af   :  { %v330_v45 = vadd.f32 1.0, %v2626_v44 }
 0x3b1   :  { %2627 = vrcp.f32 %v330_v45 }
 0x3bb   :  { %v2628_v46 = vpop.eup %2627 }
 0x3bc   :  { %v337_v50 = vmul.f32 %v2628_v46, %v335_v49 }
 0x41f   :  { %v340_v47 = vpop.permute.xlu1 %339 }
 0x420   :  { %v342_v48 = vmul.f32 %v2628_v46, %v340_v47 }
 0x422   :  { %344 = vrot.lane.b32.xlu0 %v342_v48, %s2795_s5 }
 0x494   :  { %v345_v51 = vpop.permute.xlu0 %344 }
 0x495   :  { %v347_v52 = vadd.f32 %v345_v51, %v337_v50 }
 0x497   :  { %2629 = vtanh.f32 %v347_v52  ;;  %v447_v6 = vrot.slane %v347_v52, 6 }
 0x4a1   :  { %v2630_v53 = vpop.eup %2629 }
 0x4a2   :  { %350 = vrot.lane.b32.xlu1 %v2630_v53, %s2794_s25 }
 0x514   :  { %v351_v54 = vpop.permute.xlu1 %350 }
 0x515   :  { %v2952_v55 = vmul.f32 %v2628_v46, %v351_v54 }
 0x517   :  { %v360_v56 = vrot.slane %v2952_v55, 2 }
 0x519   :  { %361 = vrot.lane.b32.xlu0 %v360_v56, %s2795_s5 }
 0x58b   :  { %v362_v57 = vpop.permute.xlu0 %361 }
 0x58c   :  { %2323 = vmatmul.mubr.msk.f32.vlgmr.msra.gmra.mrb[2].mxu1 %vm142_vm2, %v362_v57 }
 0x58d   :  { %2520 = vmatpush3.bf16.msra.mxu1 %v2886_v7  ;;  %2344 = vmatprep.mubr.msk.f32.mxu1 %vm2792_vm1, %v2793_v10 }
 0x58e   :  { %2521 = vmatprep.subr.bf16.mxu1 %v2791_v3 }
 0x591   :  { %2523 = vmatpush3.bf16.msra.mxu1 %v2901_v12 }
 0x592   :  { %2530 = vmatprep.subr.bf16.mxu1 %v2791_v3 }
 0x65f   :  { %v431_v58 = vpop.f32.mrb[2].mxu1 }
 0x660   :  { %v436_v59 = vrot.slane %v431_v58, 4  ;;  %v2324_v60 = vpop.f32.mrb[3].mxu1 }
 0x662   :  { %v438_v61 = vadd.f32 %v436_v59, %v2929_v18 }
 0x664   :  { %2631 = vtanh.f32 %v438_v61  ;;  %v2154_v63 = vmul.f32 -1.442695, %v438_v61 }
 0x666   :  { %2633 = vpow2.f32 %v2154_v63 }
 0x66e   :  { %v2632_v62 = vpop.eup %2631 }
 0x66f   :  { %451 = vrot.lane.b32.xlu1 %v2632_v62, %s2794_s25 }
 0x670   :  { %v2634_v0 = vpop.eup %2633 }
 0x671   :  { %v442_v1 = vadd.f32 1.0, %v2634_v0 }
 0x673   :  { %2635 = vrcp.f32 %v442_v1 }
 0x67d   :  { %v2636_v2 = vpop.eup %2635 }
 0x67e   :  { %v449_v8 = vmul.f32 %v2636_v2, %v447_v6 }
 0x6e1   :  { %v452_v4 = vpop.permute.xlu1 %451 }
 0x6e2   :  { %v454_v5 = vmul.f32 %v2636_v2, %v452_v4 }
 0x6e4   :  { %456 = vrot.lane.b32.xlu0 %v454_v5, %s2795_s5 }
 0x756   :  { %v457_v9 = vpop.permute.xlu0 %456 }
 0x757   :  { %v459_v11 = vadd.f32 %v457_v9, %v449_v8 }
 0x759   :  { %2637 = vtanh.f32 %v459_v11  ;;  %v559_v31 = vrot.slane %v459_v11, 6 }
 0x763   :  { %v2638_v13 = vpop.eup %2637 }
 0x764   :  { %462 = vrot.lane.b32.xlu1 %v2638_v13, %s2794_s25 }
 0x7d6   :  { %v463_v14 = vpop.permute.xlu1 %462 }
 0x7d7   :  { %v2967_v15 = vmul.f32 %v2636_v2, %v463_v14 }
 0x7d9   :  { %v472_v17 = vrot.slane %v2967_v15, 4 }
 0x7db   :  { %473 = vrot.lane.b32.xlu0 %v472_v17, %s2795_s5 }
 0x84d   :  { %v474_v19 = vpop.permute.xlu0 %473 }
 0x84e   :  { %2334 = vmatmul.mubr.msk.f32.vlgmr.msra.gmra.mrb[4].mxu0 %vm142_vm2, %v474_v19 }
 0x84f   :  { %2526 = vmatpush3.bf16.msra.mxu0 %v2886_v7  ;;  %2355 = vmatprep.mubr.msk.f32.mxu0 %vm2792_vm1, %v2793_v10 }
 0x850   :  { %2527 = vmatprep.subr.bf16.mxu0 %v2791_v3 }
 0x853   :  { %2529 = vmatpush3.bf16.msra.mxu0 %v2901_v12 }
 0x854   :  { %2536 = vmatprep.subr.bf16.mxu0 %v2791_v3 }
 0x921   :  { %v543_v20 = vpop.f32.mrb[4].mxu0 }
 0x922   :  { %v548_v21 = vrot.slane %v543_v20, 2  ;;  %v2335_v22 = vpop.f32.mrb[5].mxu0 }
 0x924   :  { %v550_v23 = vadd.f32 %v548_v21, %v2929_v18 }
 0x926   :  { %2639 = vtanh.f32 %v550_v23  ;;  %v2156_v25 = vmul.f32 -1.442695, %v550_v23 }
 0x928   :  { %2641 = vpow2.f32 %v2156_v25 }
 0x930   :  { %v2640_v24 = vpop.eup %2639 }
 0x931   :  { %563 = vrot.lane.b32.xlu1 %v2640_v24, %s2794_s25 }
 0x932   :  { %v2642_v26 = vpop.eup %2641 }
 0x933   :  { %v554_v27 = vadd.f32 1.0, %v2642_v26 }
 0x935   :  { %2643 = vrcp.f32 %v554_v27 }
 0x93f   :  { %v2644_v28 = vpop.eup %2643 }
 0x940   :  { %v561_v32 = vmul.f32 %v2644_v28, %v559_v31 }
 0x9a3   :  { %v564_v29 = vpop.permute.xlu1 %563 }
 0x9a4   :  { %v566_v30 = vmul.f32 %v2644_v28, %v564_v29 }
 0x9a6   :  { %568 = vrot.lane.b32.xlu0 %v566_v30, %s2795_s5 }
 0xa18   :  { %v569_v33 = vpop.permute.xlu0 %568 }
 0xa19   :  { %v571_v34 = vadd.f32 %v569_v33, %v561_v32 }
 0xa1b   :  { %2645 = vtanh.f32 %v571_v34  ;;  %v668_v49 = vrot.slane %v571_v34, 6 }
 0xa25   :  { %v2646_v18 = vpop.eup %2645 }
 0xa26   :  { %574 = vrot.lane.b32.xlu1 %v2646_v18, %s2794_s25 }
 0xa98   :  { %v575_v35 = vpop.permute.xlu1 %574 }
 0xa99   :  { %v2982_v36 = vmul.f32 %v2644_v28, %v575_v35 }
 0xa9b   :  { %v584_v37 = vrot.slane %v2982_v36, 6 }
 0xa9d   :  { %585 = vrot.lane.b32.xlu0 %v584_v37, %s2795_s5 }
 0xb0f   :  { %v586_v38 = vpop.permute.xlu0 %585 }
 0xb10   :  { %2345 = vmatmul.mubr.msk.f32.vlgmr.msra.gmra.mrb[4].mxu1 %vm142_vm2, %v586_v38 }
 0xb11   :  { %2532 = vmatpush3.bf16.msra.mxu1 %v2886_v7  ;;  %2366 = vmatprep.mubr.msk.f32.mxu1 %vm2792_vm1, %v2793_v10 }
 0xb12   :  { %2533 = vmatprep.subr.bf16.mxu1 %v2791_v3 }
 0xb15   :  { %2535 = vmatpush3.bf16.msra.mxu1 %v2901_v12 }
 0xbe3   :  { %v655_v39 = vpop.f32.mrb[4].mxu1 }
 0xbe4   :  { %v659_v40 = vadd.f32 %v655_v39, %v2927_v16  ;;  %v2346_v41 = vpop.f32.mrb[5].mxu1 }
 0xbe6   :  { %2647 = vtanh.f32 %v659_v40  ;;  %v2158_v43 = vmul.f32 -1.442695, %v659_v40 }
 0xbe8   :  { %2649 = vpow2.f32 %v2158_v43 }
 0xbf0   :  { %v2648_v42 = vpop.eup %2647 }
 0xbf1   :  { %672 = vrot.lane.b32.xlu1 %v2648_v42, %s2794_s25 }
 0xbf2   :  { %v2650_v44 = vpop.eup %2649 }
 0xbf3   :  { %v663_v45 = vadd.f32 1.0, %v2650_v44 }
 0xbf5   :  { %2651 = vrcp.f32 %v663_v45 }
 0xbff   :  { %v2652_v46 = vpop.eup %2651 }
 0xc00   :  { %v670_v50 = vmul.f32 %v2652_v46, %v668_v49 }
 0xc63   :  { %v673_v47 = vpop.permute.xlu1 %672 }
 0xc64   :  { %v675_v48 = vmul.f32 %v2652_v46, %v673_v47 }
 0xc66   :  { %677 = vrot.lane.b32.xlu0 %v675_v48, %s2795_s5 }
 0xcd8   :  { %v678_v51 = vpop.permute.xlu0 %677 }
 0xcd9   :  { %v680_v52 = vadd.f32 %v678_v51, %v670_v50 }
 0xcdb   :  { %2653 = vtanh.f32 %v680_v52 }
 0xce5   :  { %v2654_v53 = vpop.eup %2653 }
 0xce6   :  { %683 = vrot.lane.b32.xlu1 %v2654_v53, %s2794_s25 }
 0xd58   :  { %v684_v54 = vpop.permute.xlu1 %683 }
 0xd59   :  { %v686_v56 = vmul.f32 %v2652_v46, %v684_v54 }
 0xd5b   :  { %688 = vrot.lane.b32.xlu0 %v686_v56, %s2795_s5  ;;  %v1028_v56 = vld [vmem:[%s3275_s6] sm:$0xff] }
 0xdcd   :  { %v689_v57 = vpop.permute.xlu0 %688 }
 0xdce   :  { %691 = vst.msk [vmem:[#allocation2 + $0x8] sm:$0x3] %vm249_vm3, %v689_v57  ;;  %2356 = vmatmul.mubr.msk.f32.vlgmr.msra.gmra.mrb[6].mxu0 %vm142_vm2, %v689_v57  ;;  %v1029_v57 = vld [vmem:[%s3275_s6 + $0x8] sm:$0xff] }
 0xdcf   :  { %2538 = vmatpush3.bf16.msra.mxu0 %v2886_v7  ;;  %2377 = vmatprep.mubr.msk.f32.mxu0 %vm2792_vm1, %v2793_v10 }
 0xdd0   :  { %2539 = vmatprep.subr.bf16.mxu0 %v2791_v3 }
 0xdd3   :  { %2541 = vmatpush3.bf16.msra.mxu0 %v2901_v12  ;;  %v776_v12 = vrot.slane %v680_v52, 6 }
 0xdd4   :  { %2550 = vmatprep.subr.bf16.mxu0 %v2791_v3 }
 0xea1   :  { %v760_v58 = vpop.f32.mrb[6].mxu0 }
 0xea2   :  { %v765_v59 = vrot.slane %v760_v58, 6  ;;  %v2357_v60 = vpop.f32.mrb[7].mxu0  ;;  %v2542_v58 = vpack.c.bf16 %v1029_v57, %v1028_v56 }
 0xea3   :  { %v1030_v60 = vld [vmem:[%s3275_s6 + $0x10] sm:$0xff] }
 0xea4   :  { %v767_v61 = vadd.f32 %v765_v59, %v2927_v16  ;;  %2543 = vmatprep.subr.bf16.mxu1 %v2542_v58  ;;  %v1032_v59 = vld [vmem:[%s3276_s7] sm:$0xff] }
 0xea6   :  { %2655 = vtanh.f32 %v767_v61  ;;  %v2160_v63 = vmul.f32 -1.442695, %v767_v61 }
 0xea8   :  { %2657 = vpow2.f32 %v2160_v63  ;;  %v1034_v63 = vld [vmem:[%s3276_s7 + $0x10] sm:$0xff] }
 0xeb0   :  { %v2656_v62 = vpop.eup %2655 }
 0xeb1   :  { %780 = vrot.lane.b32.xlu1 %v2656_v62, %s2794_s25  ;;  %v1031_v62 = vld [vmem:[%s3275_s6 + $0x18] sm:$0xff] }
 0xeb2   :  { %v2658_v7 = vpop.eup %2657 }
 0xeb3   :  { %v771_v0 = vadd.f32 1.0, %v2658_v7  ;;  %v1035_v7 = vld [vmem:[%s3276_s7 + $0x18] sm:$0xff] }
 0xeb5   :  { %2659 = vrcp.f32 %v771_v0  ;;  %v2546_v0 = vpack.c.bf16 %v1031_v62, %v1030_v60 }
 0xebf   :  { %v2660_v1 = vpop.eup %2659 }
 0xec0   :  { %v778_v5 = vmul.f32 %v2660_v1, %v776_v12 }
 0xf23   :  { %v781_v2 = vpop.permute.xlu1 %780 }
 0xf24   :  { %v783_v4 = vmul.f32 %v2660_v1, %v781_v2  ;;  %v2168_v2 = vld [vmem:[%s3270_s1 + $0x2] sm:$0x3] }
 0xf26   :  { %785 = vrot.lane.b32.xlu0 %v783_v4, %s2795_s5 }
 0xf98   :  { %v786_v6 = vpop.permute.xlu0 %785 }
 0xf99   :  { %v788_v8 = vadd.f32 %v786_v6, %v778_v5  ;;  %v2169_v6 = vld [vmem:[%s3271_s2 + $0x2] sm:$0x3] }
 0xf9b   :  { %2661 = vtanh.f32 %v788_v8  ;;  %v887_v30 = vrot.slane %v788_v8, 6 }
 0xfa5   :  { %v2662_v9 = vpop.eup %2661 }
 0xfa6   :  { %791 = vrot.lane.b32.xlu1 %v2662_v9, %s2794_s25 }
0x1018   :  { %v792_v11 = vpop.permute.xlu1 %791 }
0x1019   :  { %v3009_v13 = vmul.f32 %v2660_v1, %v792_v11  ;;  %v3068_v1 = vpack.c.bf16 %v1035_v7, %v1034_v63 }
0x101b   :  { %v800_v14 = vrot.slane %v3009_v13, 2 }
0x101d   :  { %801 = vrot.lane.b32.xlu0 %v800_v14, %s2795_s5 }
0x108f   :  { %v802_v17 = vpop.permute.xlu0 %801 }
0x1090   :  { %2367 = vmatmul.mubr.msk.f32.vlgmr.msra.gmra.mrb[6].mxu1 %vm142_vm2, %v802_v17 }
0x1091   :  { %2545 = vmatpush3.bf16.msra.mxu1 %v2542_v58 }
0x1092   :  { %2547 = vmatprep.subr.bf16.mxu1 %v2546_v0 }
0x1095   :  { %2549 = vmatpush3.bf16.msra.mxu1 %v2546_v0 }
0x1096   :  { %2556 = vmatprep.subr.bf16.mxu1 %v2791_v3 }
0x1163   :  { %v871_v19 = vpop.f32.mrb[6].mxu1 }
0x1164   :  { %v876_v20 = vrot.slane %v871_v19, 4  ;;  %v2368_v21 = vpop.f32.mrb[7].mxu1  ;;  %v2165_v19 = vld [vmem:[%s3277_s8] ss:$0 sm:$0xff]  ;;  %s2796_s8 = smov 96  }
0x1166   :  { %v878_v22 = vadd.f32 %v876_v20, %v2927_v16 }
0x1168   :  { %2663 = vtanh.f32 %v878_v22  ;;  %v2162_v24 = vmul.f32 -1.442695, %v878_v22 }
0x116a   :  { %2665 = vpow2.f32 %v2162_v24 }
0x1172   :  { %v2664_v23 = vpop.eup %2663 }
0x1173   :  { %891 = vrot.lane.b32.xlu1 %v2664_v23, %s2794_s25 }
0x1174   :  { %v2666_v25 = vpop.eup %2665 }
0x1175   :  { %v882_v26 = vadd.f32 1.0, %v2666_v25 }
0x1177   :  { %2667 = vrcp.f32 %v882_v26 }
0x1181   :  { %v2668_v27 = vpop.eup %2667 }
0x1182   :  { %v889_v31 = vmul.f32 %v2668_v27, %v887_v30 }
0x11e5   :  { %v892_v28 = vpop.permute.xlu1 %891 }
0x11e6   :  { %v894_v29 = vmul.f32 %v2668_v27, %v892_v28 }
0x11e8   :  { %896 = vrot.lane.b32.xlu0 %v894_v29, %s2795_s5 }
0x125a   :  { %v897_v32 = vpop.permute.xlu0 %896 }
0x125b   :  { %v899_v33 = vadd.f32 %v897_v32, %v889_v31 }
0x125d   :  { %2669 = vtanh.f32 %v899_v33 }
0x1267   :  { %v2670_v34 = vpop.eup %2669 }
0x1268   :  { %902 = vrot.lane.b32.xlu1 %v2670_v34, %s2794_s25 }
0x12da   :  { %v903_v18 = vpop.permute.xlu1 %902 }
0x12db   :  { %v905_v35 = vmul.f32 %v2668_v27, %v903_v18 }
0x12dd   :  { %v911_v37 = vrot.slane %v905_v35, 4 }
0x12df   :  { %912 = vrot.lane.b32.xlu0 %v911_v37, %s2795_s5 }
0x1351   :  { %v913_v38 = vpop.permute.xlu0 %912 }
0x1352   :  { %2378 = vmatmul.mubr.msk.f32.vlgmr.msra.gmra.mrb[8].mxu0 %vm142_vm2, %v913_v38 }
0x1353   :  { %2399 = vmatprep.mubr.msk.f32.mxu0 %vm2792_vm1, %v2793_v10 }
0x1425   :  { %v982_v39 = vpop.f32.mrb[8].mxu0 }
0x1426   :  { %v987_v40 = vrot.slane %v982_v39, 2  ;;  %v2379_v41 = vpop.f32.mrb[9].mxu0 }
0x1428   :  { %v989_v42 = vadd.f32 %v987_v40, %v2927_v16  ;;  %v998_v16 = vrot.slane %v899_v33, 6 }
0x142a   :  { %2671 = vtanh.f32 %v989_v42  ;;  %v2164_v44 = vmul.f32 -1.442695, %v989_v42 }
0x142c   :  { %2673 = vpow2.f32 %v2164_v44 }
0x1434   :  { %v2672_v43 = vpop.eup %2671 }
0x1435   :  { %1002 = vrot.lane.b32.xlu1 %v2672_v43, %s2794_s25 }
0x1436   :  { %v2674_v45 = vpop.eup %2673 }
0x1437   :  { %v993_v46 = vadd.f32 1.0, %v2674_v45 }
0x1439   :  { %2675 = vrcp.f32 %v993_v46 }
0x1443   :  { %v2676_v47 = vpop.eup %2675 }
0x1444   :  { %v1000_v50 = vmul.f32 %v2676_v47, %v998_v16 }
0x14a7   :  { %v1003_v48 = vpop.permute.xlu1 %1002 }
0x14a8   :  { %v1005_v49 = vmul.f32 %v2676_v47, %v1003_v48 }
0x14aa   :  { %1007 = vrot.lane.b32.xlu0 %v1005_v49, %s2795_s5 }
0x14ae   :  { %355 = vrot.lane.b32.xlu0 %v2952_v55, %s2795_s5 }
0x14b2   :  { %579 = vrot.lane.b32.xlu0 %v2982_v36, %s2795_s5 }
0x14b6   :  { %907 = vrot.lane.b32.xlu0 %v905_v35, %s2795_s5 }
0x151c   :  { %v1008_v51 = vpop.permute.xlu0 %1007 }
0x151d   :  { %v3030_v52 = vadd.f32 %v1008_v51, %v1000_v50 }
0x151f   :  { %2677 = vtanh.f32 %v3030_v52 }
0x1520   :  { %v356_v53 = vpop.permute.xlu0 %355 }
0x1521   :  { %359 = vst.msk [vmem:[#allocation2] sm:$0xc] %vm358_vm4, %v356_v53 }
0x1524   :  { %v580_v54 = vpop.permute.xlu0 %579 }
0x1525   :  { %583 = vst.msk [vmem:[#allocation2] sm:$0xc0] %vm582_vm5, %v580_v54 }
0x1528   :  { %v908_v55 = vpop.permute.xlu0 %907 }
0x1529   :  { %v2678_v36 = vpop.eup %2677  ;;  %910 = vst.msk [vmem:[#allocation2 + $0x8] sm:$0x30] %vm470_vm6, %v908_v55 }
0x152a   :  { %1013 = vrot.lane.b32.xlu1 %v2678_v36, %s2794_s25 }
0x152e   :  { %467 = vrot.lane.b32.xlu1 %v2967_v15, %s2795_s5  ;;  %v1033_v15 = vld [vmem:[%s3276_s7 + $0x8] sm:$0xff] }
0x152f   :  { %v3056_v61 = vpack.c.bf16 %v1033_v15, %v1032_v59 }
0x1531   :  { %2552 = vmatpush3.bf16.msra.mxu0 %v3056_v61 }
0x1532   :  { %796 = vrot.lane.b32.xlu1 %v3009_v13, %s2795_s5  ;;  %2553 = vmatprep.subr.bf16.mxu0 %v2791_v3 }
0x1535   :  { %2555 = vmatpush3.bf16.msra.mxu0 %v3068_v1 }
0x1536   :  { %2562 = vmatprep.subr.bf16.mxu0 %v2791_v3 }
0x1538   :  { %2400 = vmatmul.mubr.msk.f32.vlgmr.msra.gmra.mrb[10].mxu0 %vm142_vm2, %v2168_v2 }
0x1539   :  { %2564 = vmatpush3.bf16.msra.mxu0 %v3056_v61  ;;  %2421 = vmatprep.mubr.msk.f32.mxu0 %vm2792_vm1, %v2793_v10 }
0x153a   :  { %2565 = vmatprep.subr.bf16.mxu0 %v2791_v3 }
0x153d   :  { %2567 = vmatpush3.bf16.msra.mxu0 %v3068_v1 }
0x153e   :  { %2574 = vmatprep.subr.bf16.mxu0 %v2791_v3 }
0x159c   :  { %v1014_v4 = vpop.permute.xlu1 %1013 }
0x159d   :  { %v1016_v12 = vmul.f32 %v2676_v47, %v1014_v4 }
0x159f   :  { %1018 = vrot.lane.b32.xlu1 %v1016_v12, %s2795_s5 }
0x15a0   :  { %v468_v5 = vpop.permute.xlu1 %467 }
0x15a1   :  { %471 = vst.msk [vmem:[#allocation2] sm:$0x30] %vm470_vm6, %v468_v5 }
0x15a3   :  { %1212 = vrot.lane.b32.xlu1 %v2169_v6, %s2795_s5 }
0x15a4   :  { %v797_v8 = vpop.permute.xlu1 %796 }
0x15a5   :  { %799 = vst.msk [vmem:[#allocation2 + $0x8] sm:$0xc] %vm358_vm4, %v797_v8 }
0x15a8   :  { %v1037_v9 = vld [vmem:[#allocation2] sm:$0xff] }
0x15a9   :  { %2388 = vmatprep.mubr.msk.f32.mxu1 %vm142_vm2, %v1037_v9 }
0x160b   :  { %v1199_v14 = vpop.f32.mrb[10].mxu0 }
0x160c   :  { %v2401_v17 = vpop.f32.mrb[11].mxu0 }
0x1611   :  { %v1019_v11 = vpop.permute.xlu1 %1018 }
0x1612   :  { %1021 = vst.msk [vmem:[#allocation2 + $0x8] sm:$0xc0] %vm582_vm5, %v1019_v11  ;;  %1022 = vst.msk [vmem:[#allocation4 - $0x6] sm:$0xc0] %vm582_vm5, %v1019_v11 }
0x1615   :  { %v1213_v32 = vpop.permute.xlu1 %1212 }
0x1619   :  { %v1038_v13 = vld [vmem:[#allocation2 + $0x8] sm:$0xff] }
0x161a   :  { %2389 = vmatmul.mubr.msk.f32.vlgmr.msra.gmra.mrb[8].mxu1 %vm142_vm2, %v1038_v13 }
0x161b   :  { %2558 = vmatpush3.bf16.msra.mxu1 %v3056_v61  ;;  %2410 = vmatprep.mubr.msk.f32.mxu1 %vm2792_vm1, %v2793_v10 }
0x161c   :  { %2559 = vmatprep.subr.bf16.mxu1 %v2791_v3 }
0x161f   :  { %2561 = vmatpush3.bf16.msra.mxu1 %v3068_v1 }
0x1620   :  { %2568 = vmatprep.subr.bf16.mxu1 %v2791_v3 }
0x16ed   :  { %v2390_v20 = vpop.f32.mrb[8].mxu1 }
0x16ee   :  { %v3104_v21 = vadd.f32 %v2390_v20, %v2165_v19  ;;  %v1117_v22 = vpop.f32.mrb[9].mxu1 }
0x16ef   :  { %v3106_v23 = vadd.f32 %v2165_v19, %v1117_v22 }
0x16f1   :  { %v1203_v24 = vadd.f32 %v1199_v14, %v3106_v23 }
0x16f3   :  { %2679 = vtanh.f32 %v1203_v24  ;;  %v2171_v26 = vmul.f32 -1.442695, %v1203_v24 }
0x16f5   :  { %2681 = vpow2.f32 %v2171_v26 }
0x16fd   :  { %v2680_v25 = vpop.eup %2679 }
0x16fe   :  { %1217 = vrot.lane.b32.xlu0 %v2680_v25, %s2794_s25 }
0x16ff   :  { %v2682_v27 = vpop.eup %2681 }
0x1700   :  { %v1207_v28 = vadd.f32 1.0, %v2682_v27 }
0x1702   :  { %2683 = vrcp.f32 %v1207_v28 }
0x170c   :  { %v2684_v29 = vpop.eup %2683 }
0x170d   :  { %v1215_v33 = vmul.f32 %v2684_v29, %v1213_v32 }
0x1770   :  { %v1218_v30 = vpop.permute.xlu0 %1217 }
0x1771   :  { %v1220_v31 = vmul.f32 %v2684_v29, %v1218_v30 }
0x1773   :  { %1222 = vrot.lane.b32.xlu0 %v1220_v31, %s2795_s5 }
0x17e5   :  { %v1223_v34 = vpop.permute.xlu0 %1222 }
0x17e6   :  { %v1225_v18 = vadd.f32 %v1223_v34, %v1215_v33 }
0x17e8   :  { %2685 = vtanh.f32 %v1225_v18  ;;  %v1321_v50 = vrot.slane %v1225_v18, 6 }
0x17f2   :  { %v2686_v35 = vpop.eup %2685 }
0x17f3   :  { %1228 = vrot.lane.b32.xlu1 %v2686_v35, %s2794_s25 }
0x1865   :  { %v1229_v37 = vpop.permute.xlu1 %1228 }
0x1866   :  { %v1231_v38 = vmul.f32 %v2684_v29, %v1229_v37 }
0x1868   :  { %1233 = vrot.lane.b32.xlu0 %v1231_v38, %s2795_s5 }
0x18da   :  { %v1234_v39 = vpop.permute.xlu0 %1233 }
0x18db   :  { %1236 = vst.msk [vmem:[#allocation3] sm:$0x3] %vm249_vm3, %v1234_v39  ;;  %2411 = vmatmul.mubr.msk.f32.vlgmr.msra.gmra.mrb[10].mxu1 %vm142_vm2, %v1234_v39 }
0x18dc   :  { %2570 = vmatpush3.bf16.msra.mxu1 %v3056_v61  ;;  %2432 = vmatprep.mubr.msk.f32.mxu1 %vm2792_vm1, %v2793_v10 }
0x18dd   :  { %2571 = vmatprep.subr.bf16.mxu1 %v2791_v3 }
0x18e0   :  { %2573 = vmatpush3.bf16.msra.mxu1 %v3068_v1 }
0x18e1   :  { %2580 = vmatprep.subr.bf16.mxu1 %v2791_v3 }
0x19ae   :  { %v1305_v40 = vpop.f32.mrb[10].mxu1 }
0x19af   :  { %v1310_v41 = vrot.slane %v1305_v40, 6  ;;  %v2412_v42 = vpop.f32.mrb[11].mxu1 }
0x19b1   :  { %v1312_v43 = vadd.f32 %v1310_v41, %v3106_v23 }
0x19b3   :  { %2687 = vtanh.f32 %v1312_v43  ;;  %v2173_v45 = vmul.f32 -1.442695, %v1312_v43 }
0x19b5   :  { %2689 = vpow2.f32 %v2173_v45 }
0x19bd   :  { %v2688_v44 = vpop.eup %2687 }
0x19be   :  { %1325 = vrot.lane.b32.xlu1 %v2688_v44, %s2794_s25 }
0x19bf   :  { %v2690_v46 = vpop.eup %2689 }
0x19c0   :  { %v1316_v47 = vadd.f32 1.0, %v2690_v46 }
0x19c2   :  { %2691 = vrcp.f32 %v1316_v47 }
0x19cc   :  { %v2692_v48 = vpop.eup %2691 }
0x19cd   :  { %v1323_v51 = vmul.f32 %v2692_v48, %v1321_v50 }
0x1a30   :  { %v1326_v49 = vpop.permute.xlu1 %1325 }
0x1a31   :  { %v1328_v16 = vmul.f32 %v2692_v48, %v1326_v49 }
0x1a33   :  { %1330 = vrot.lane.b32.xlu0 %v1328_v16, %s2795_s5 }
0x1aa5   :  { %v1331_v53 = vpop.permute.xlu0 %1330 }
0x1aa6   :  { %v1333_v54 = vadd.f32 %v1331_v53, %v1323_v51 }
0x1aa8   :  { %2693 = vtanh.f32 %v1333_v54  ;;  %v1432_v6 = vrot.slane %v1333_v54, 6 }
0x1ab2   :  { %v2694_v55 = vpop.eup %2693 }
0x1ab3   :  { %1336 = vrot.lane.b32.xlu1 %v2694_v55, %s2794_s25 }
0x1b25   :  { %v1337_v36 = vpop.permute.xlu1 %1336 }
0x1b26   :  { %v3125_v56 = vmul.f32 %v2692_v48, %v1337_v36 }
0x1b28   :  { %v1345_v57 = vrot.slane %v3125_v56, 2 }
0x1b2a   :  { %1346 = vrot.lane.b32.xlu0 %v1345_v57, %s2795_s5 }
0x1b9c   :  { %v1347_v58 = vpop.permute.xlu0 %1346 }
0x1b9d   :  { %2422 = vmatmul.mubr.msk.f32.vlgmr.msra.gmra.mrb[12].mxu0 %vm142_vm2, %v1347_v58 }
0x1b9e   :  { %2576 = vmatpush3.bf16.msra.mxu0 %v3056_v61  ;;  %2443 = vmatprep.mubr.msk.f32.mxu0 %vm2792_vm1, %v2793_v10 }
0x1b9f   :  { %2577 = vmatprep.subr.bf16.mxu0 %v2791_v3 }
0x1ba2   :  { %2579 = vmatpush3.bf16.msra.mxu0 %v3068_v1 }
0x1ba3   :  { %2586 = vmatprep.subr.bf16.mxu0 %v2791_v3 }
0x1c70   :  { %v1416_v59 = vpop.f32.mrb[12].mxu0 }
0x1c71   :  { %v1421_v15 = vrot.slane %v1416_v59, 4  ;;  %v2423_v60 = vpop.f32.mrb[13].mxu0 }
0x1c73   :  { %v1423_v62 = vadd.f32 %v1421_v15, %v3106_v23 }
0x1c75   :  { %2695 = vtanh.f32 %v1423_v62  ;;  %v2175_v7 = vmul.f32 -1.442695, %v1423_v62 }
0x1c77   :  { %2697 = vpow2.f32 %v2175_v7 }
0x1c7f   :  { %v2696_v63 = vpop.eup %2695 }
0x1c80   :  { %1436 = vrot.lane.b32.xlu1 %v2696_v63, %s2794_s25 }
0x1c81   :  { %v2698_v0 = vpop.eup %2697 }
0x1c82   :  { %v1427_v2 = vadd.f32 1.0, %v2698_v0 }
0x1c84   :  { %2699 = vrcp.f32 %v1427_v2 }
0x1c8e   :  { %v2700_v4 = vpop.eup %2699 }
0x1c8f   :  { %v1434_v8 = vmul.f32 %v2700_v4, %v1432_v6 }
0x1cf2   :  { %v1437_v12 = vpop.permute.xlu1 %1436 }
0x1cf3   :  { %v1439_v5 = vmul.f32 %v2700_v4, %v1437_v12 }
0x1cf5   :  { %1441 = vrot.lane.b32.xlu0 %v1439_v5, %s2795_s5 }
0x1d67   :  { %v1442_v9 = vpop.permute.xlu0 %1441 }
0x1d68   :  { %v1444_v11 = vadd.f32 %v1442_v9, %v1434_v8 }
0x1d6a   :  { %2701 = vtanh.f32 %v1444_v11  ;;  %v1543_v34 = vrot.slane %v1444_v11, 6 }
0x1d74   :  { %v2702_v13 = vpop.eup %2701 }
0x1d75   :  { %1447 = vrot.lane.b32.xlu1 %v2702_v13, %s2794_s25 }
0x1de7   :  { %v1448_v14 = vpop.permute.xlu1 %1447 }
0x1de8   :  { %v3140_v17 = vmul.f32 %v2700_v4, %v1448_v14 }
0x1dea   :  { %v1456_v19 = vrot.slane %v3140_v17, 4 }
0x1dec   :  { %1457 = vrot.lane.b32.xlu0 %v1456_v19, %s2795_s5 }
0x1e5e   :  { %v1458_v20 = vpop.permute.xlu0 %1457 }
0x1e5f   :  { %2433 = vmatmul.mubr.msk.f32.vlgmr.msra.gmra.mrb[12].mxu1 %vm142_vm2, %v1458_v20 }
0x1e60   :  { %2582 = vmatpush3.bf16.msra.mxu1 %v3056_v61  ;;  %2454 = vmatprep.mubr.msk.f32.mxu1 %vm2792_vm1, %v2793_v10 }
0x1e61   :  { %2583 = vmatprep.subr.bf16.mxu1 %v2791_v3 }
0x1e64   :  { %2585 = vmatpush3.bf16.msra.mxu1 %v3068_v1 }
0x1e65   :  { %2592 = vmatprep.subr.bf16.mxu1 %v2791_v3 }
0x1f32   :  { %v1527_v22 = vpop.f32.mrb[12].mxu1 }
0x1f33   :  { %v1532_v24 = vrot.slane %v1527_v22, 2  ;;  %v2434_v25 = vpop.f32.mrb[13].mxu1 }
0x1f35   :  { %v1534_v26 = vadd.f32 %v1532_v24, %v3106_v23 }
0x1f37   :  { %2703 = vtanh.f32 %v1534_v26  ;;  %v2177_v28 = vmul.f32 -1.442695, %v1534_v26 }
0x1f39   :  { %2705 = vpow2.f32 %v2177_v28 }
0x1f41   :  { %v2704_v27 = vpop.eup %2703 }
0x1f42   :  { %1547 = vrot.lane.b32.xlu1 %v2704_v27, %s2794_s25 }
0x1f43   :  { %v2706_v29 = vpop.eup %2705 }
0x1f44   :  { %v1538_v30 = vadd.f32 1.0, %v2706_v29 }
0x1f46   :  { %2707 = vrcp.f32 %v1538_v30 }
0x1f50   :  { %v2708_v31 = vpop.eup %2707 }
0x1f51   :  { %v1545_v18 = vmul.f32 %v2708_v31, %v1543_v34 }
0x1fb4   :  { %v1548_v32 = vpop.permute.xlu1 %1547 }
0x1fb5   :  { %v1550_v33 = vmul.f32 %v2708_v31, %v1548_v32 }
0x1fb7   :  { %1552 = vrot.lane.b32.xlu0 %v1550_v33, %s2795_s5 }
0x2029   :  { %v1553_v35 = vpop.permute.xlu0 %1552 }
0x202a   :  { %v1555_v37 = vadd.f32 %v1553_v35, %v1545_v18 }
0x202c   :  { %2709 = vtanh.f32 %v1555_v37  ;;  %v1651_v51 = vrot.slane %v1555_v37, 6 }
0x2036   :  { %v2710_v23 = vpop.eup %2709 }
0x2037   :  { %1558 = vrot.lane.b32.xlu1 %v2710_v23, %s2794_s25 }
0x20a9   :  { %v1559_v38 = vpop.permute.xlu1 %1558 }
0x20aa   :  { %v3155_v39 = vmul.f32 %v2708_v31, %v1559_v38 }
0x20ac   :  { %v1567_v40 = vrot.slane %v3155_v39, 6 }
0x20ae   :  { %1568 = vrot.lane.b32.xlu0 %v1567_v40, %s2795_s5 }
0x2120   :  { %v1569_v41 = vpop.permute.xlu0 %1568 }
0x2121   :  { %2444 = vmatmul.mubr.msk.f32.vlgmr.msra.gmra.mrb[14].mxu0 %vm142_vm2, %v1569_v41 }
0x2122   :  { %2588 = vmatpush3.bf16.msra.mxu0 %v3056_v61  ;;  %2465 = vmatprep.mubr.msk.f32.mxu0 %vm2792_vm1, %v2793_v10 }
0x2123   :  { %2589 = vmatprep.subr.bf16.mxu0 %v2791_v3 }
0x2126   :  { %2591 = vmatpush3.bf16.msra.mxu0 %v3068_v1 }
0x21f4   :  { %v1638_v42 = vpop.f32.mrb[14].mxu0 }
0x21f5   :  { %v1642_v43 = vadd.f32 %v1638_v42, %v3104_v21  ;;  %v2445_v44 = vpop.f32.mrb[15].mxu0 }
0x21f7   :  { %2711 = vtanh.f32 %v1642_v43  ;;  %v2179_v46 = vmul.f32 -1.442695, %v1642_v43 }
0x21f9   :  { %2713 = vpow2.f32 %v2179_v46 }
0x2201   :  { %v2712_v45 = vpop.eup %2711 }
0x2202   :  { %1655 = vrot.lane.b32.xlu1 %v2712_v45, %s2794_s25 }
0x2203   :  { %v2714_v47 = vpop.eup %2713 }
0x2204   :  { %v1646_v48 = vadd.f32 1.0, %v2714_v47 }
0x2206   :  { %2715 = vrcp.f32 %v1646_v48 }
0x2210   :  { %v2716_v49 = vpop.eup %2715 }
0x2211   :  { %v1653_v53 = vmul.f32 %v2716_v49, %v1651_v51 }
0x2274   :  { %v1656_v16 = vpop.permute.xlu1 %1655 }
0x2275   :  { %v1658_v50 = vmul.f32 %v2716_v49, %v1656_v16 }
0x2277   :  { %1660 = vrot.lane.b32.xlu0 %v1658_v50, %s2795_s5 }
0x22e9   :  { %v1661_v54 = vpop.permute.xlu0 %1660 }
0x22ea   :  { %v1663_v55 = vadd.f32 %v1661_v54, %v1653_v53 }
0x22ec   :  { %2717 = vtanh.f32 %v1663_v55 }
0x22f6   :  { %v2718_v36 = vpop.eup %2717 }
0x22f7   :  { %1666 = vrot.lane.b32.xlu1 %v2718_v36, %s2794_s25 }
0x2369   :  { %v1667_v57 = vpop.permute.xlu1 %1666 }
0x236a   :  { %v1669_v58 = vmul.f32 %v2716_v49, %v1667_v57 }
0x236c   :  { %1671 = vrot.lane.b32.xlu0 %v1669_v58, %s2795_s5  ;;  %v2016_v58 = vld [vmem:[%s3278_s9 + $0x8] sm:$0xff] }
0x23de   :  { %v1672_v59 = vpop.permute.xlu0 %1671 }
0x23df   :  { %1674 = vst.msk [vmem:[#allocation3 + $0x8] sm:$0x3] %vm249_vm3, %v1672_v59  ;;  %2455 = vmatmul.mubr.msk.f32.vlgmr.msra.gmra.mrb[14].mxu1 %vm142_vm2, %v1672_v59 }
0x23e0   :  { %2594 = vmatpush3.bf16.msra.mxu1 %v3056_v61  ;;  %2476 = vmatprep.mubr.msk.f32.mxu1 %vm2792_vm1, %v2793_v10 }
0x23e1   :  { %2595 = vmatprep.subr.bf16.mxu1 %v2791_v3  ;;  %v1759_v3 = vrot.slane %v1663_v55, 6 }
0x23e4   :  { %2597 = vmatpush3.bf16.msra.mxu1 %v3068_v1 }
0x24b2   :  { %v1743_v15 = vpop.f32.mrb[14].mxu1 }
0x24b3   :  { %v1748_v60 = vrot.slane %v1743_v15, 6  ;;  %v2456_v62 = vpop.f32.mrb[15].mxu1  ;;  %v2017_v15 = vld [vmem:[%s3278_s9 + $0x10] sm:$0xff] }
0x24b5   :  { %v1750_v63 = vadd.f32 %v1748_v60, %v3104_v21 }
0x24b7   :  { %2719 = vtanh.f32 %v1750_v63  ;;  %v2181_v0 = vmul.f32 -1.442695, %v1750_v63 }
0x24b9   :  { %2721 = vpow2.f32 %v2181_v0 }
0x24c1   :  { %v2720_v7 = vpop.eup %2719 }
0x24c2   :  { %1763 = vrot.lane.b32.xlu1 %v2720_v7, %s2794_s25 }
0x24c3   :  { %v2722_v2 = vpop.eup %2721 }
0x24c4   :  { %v1754_v61 = vadd.f32 1.0, %v2722_v2 }
0x24c6   :  { %2723 = vrcp.f32 %v1754_v61 }
0x24d0   :  { %v2724_v4 = vpop.eup %2723 }
0x24d1   :  { %v1761_v1 = vmul.f32 %v2724_v4, %v1759_v3 }
0x2534   :  { %v1764_v10 = vpop.permute.xlu1 %1763 }
0x2535   :  { %v1766_v12 = vmul.f32 %v2724_v4, %v1764_v10 }
0x2537   :  { %1768 = vrot.lane.b32.xlu0 %v1766_v12, %s2795_s5 }
0x25a9   :  { %v1769_v5 = vpop.permute.xlu0 %1768 }
0x25aa   :  { %v1771_v6 = vadd.f32 %v1769_v5, %v1761_v1 }
0x25ac   :  { %2725 = vtanh.f32 %v1771_v6  ;;  %v1870_v32 = vrot.slane %v1771_v6, 6 }
0x25b6   :  { %v2726_v8 = vpop.eup %2725 }
0x25b7   :  { %1774 = vrot.lane.b32.xlu1 %v2726_v8, %s2794_s25 }
0x2629   :  { %v1775_v9 = vpop.permute.xlu1 %1774 }
0x262a   :  { %v3181_v11 = vmul.f32 %v2724_v4, %v1775_v9 }
0x262c   :  { %v1783_v13 = vrot.slane %v3181_v11, 2 }
0x262e   :  { %1784 = vrot.lane.b32.xlu0 %v1783_v13, %s2795_s5 }
0x26a0   :  { %v1785_v14 = vpop.permute.xlu0 %1784 }
0x26a1   :  { %2466 = vmatmul.mubr.msk.f32.vlgmr.msra.gmra.mrb[16].mxu0 %vm142_vm2, %v1785_v14 }
0x2774   :  { %v1854_v19 = vpop.f32.mrb[16].mxu0 }
0x2775   :  { %v1859_v20 = vrot.slane %v1854_v19, 4  ;;  %v2467_v22 = vpop.f32.mrb[17].mxu0 }
0x2777   :  { %v1861_v24 = vadd.f32 %v1859_v20, %v3104_v21 }
0x2779   :  { %2727 = vtanh.f32 %v1861_v24  ;;  %v2183_v26 = vmul.f32 -1.442695, %v1861_v24 }
0x277b   :  { %2729 = vpow2.f32 %v2183_v26 }
0x2783   :  { %v2728_v25 = vpop.eup %2727 }
0x2784   :  { %1874 = vrot.lane.b32.xlu1 %v2728_v25, %s2794_s25 }
0x2785   :  { %v2730_v27 = vpop.eup %2729 }
0x2786   :  { %v1865_v28 = vadd.f32 1.0, %v2730_v27 }
0x2788   :  { %2731 = vrcp.f32 %v1865_v28 }
0x2792   :  { %v2732_v29 = vpop.eup %2731 }
0x2793   :  { %v1872_v33 = vmul.f32 %v2732_v29, %v1870_v32 }
0x27f6   :  { %v1875_v30 = vpop.permute.xlu1 %1874 }
0x27f7   :  { %v1877_v31 = vmul.f32 %v2732_v29, %v1875_v30 }
0x27f9   :  { %1879 = vrot.lane.b32.xlu0 %v1877_v31, %s2795_s5 }
0x286b   :  { %v1880_v34 = vpop.permute.xlu0 %1879 }
0x286c   :  { %v1882_v18 = vadd.f32 %v1880_v34, %v1872_v33 }
0x286e   :  { %2733 = vtanh.f32 %v1882_v18 }
0x2878   :  { %v2734_v35 = vpop.eup %2733 }
0x2879   :  { %1885 = vrot.lane.b32.xlu1 %v2734_v35, %s2794_s25 }
0x28eb   :  { %v1886_v37 = vpop.permute.xlu1 %1885 }
0x28ec   :  { %v1888_v23 = vmul.f32 %v2732_v29, %v1886_v37 }
0x28ee   :  { %v1894_v38 = vrot.slane %v1888_v23, 4 }
0x28f0   :  { %1895 = vrot.lane.b32.xlu0 %v1894_v38, %s2795_s5 }
0x2962   :  { %v1896_v40 = vpop.permute.xlu0 %1895 }
0x2963   :  { %2477 = vmatmul.mubr.msk.f32.vlgmr.msra.gmra.mrb[16].mxu1 %vm142_vm2, %v1896_v40 }
0x2a36   :  { %v1965_v41 = vpop.f32.mrb[16].mxu1 }
0x2a37   :  { %v1970_v42 = vrot.slane %v1965_v41, 2  ;;  %v2478_v43 = vpop.f32.mrb[17].mxu1 }
0x2a39   :  { %v1972_v44 = vadd.f32 %v1970_v42, %v3104_v21  ;;  %v1981_v21 = vrot.slane %v1882_v18, 6 }
0x2a3b   :  { %2735 = vtanh.f32 %v1972_v44  ;;  %v2185_v46 = vmul.f32 -1.442695, %v1972_v44 }
0x2a3d   :  { %2737 = vpow2.f32 %v2185_v46 }
0x2a45   :  { %v2736_v45 = vpop.eup %2735 }
0x2a46   :  { %1985 = vrot.lane.b32.xlu1 %v2736_v45, %s2794_s25 }
0x2a47   :  { %v2738_v47 = vpop.eup %2737 }
0x2a48   :  { %v1976_v48 = vadd.f32 1.0, %v2738_v47 }
0x2a4a   :  { %2739 = vrcp.f32 %v1976_v48 }
0x2a54   :  { %v2740_v49 = vpop.eup %2739 }
0x2a55   :  { %v1983_v51 = vmul.f32 %v2740_v49, %v1981_v21 }
0x2ab8   :  { %v1986_v16 = vpop.permute.xlu1 %1985 }
0x2ab9   :  { %v1988_v50 = vmul.f32 %v2740_v49, %v1986_v16 }
0x2abb   :  { %1990 = vrot.lane.b32.xlu0 %v1988_v50, %s2795_s5 }
0x2abf   :  { %1341 = vrot.lane.b32.xlu0 %v3125_v56, %s2795_s5 }
0x2ac3   :  { %1563 = vrot.lane.b32.xlu0 %v3155_v39, %s2795_s5 }
0x2ac7   :  { %1890 = vrot.lane.b32.xlu0 %v1888_v23, %s2795_s5 }
0x2acb   :  { %1024 = vrot.lane.b32.xlu0 %v3030_v52, %s2796_s8  ;;  %v2015_v52 = vld [vmem:[%s3278_s9] sm:$0xff] }
0x2acc   :  { %v2598_v59 = vpack.c.bf16 %v2016_v58, %v2015_v52 }
0x2ace   :  { %2599 = vmatprep.subr.bf16.mxu0 %v2598_v59 }
0x2acf   :  { %2601 = vmatpush3.bf16.msra.mxu0 %v2598_v59 }
0x2b2d   :  { %v1991_v53 = vpop.permute.xlu0 %1990 }
0x2b2e   :  { %v1993_v54 = vadd.f32 %v1991_v53, %v1983_v51 }
0x2b30   :  { %2741 = vtanh.f32 %v1993_v54 }
0x2b31   :  { %v1342_v55 = vpop.permute.xlu0 %1341 }
0x2b32   :  { %1344 = vst.msk [vmem:[#allocation3] sm:$0xc] %vm358_vm4, %v1342_v55 }
0x2b35   :  { %v1564_v36 = vpop.permute.xlu0 %1563 }
0x2b36   :  { %1566 = vst.msk [vmem:[#allocation3] sm:$0xc0] %vm582_vm5, %v1564_v36 }
0x2b39   :  { %v1891_v56 = vpop.permute.xlu0 %1890 }
0x2b3a   :  { %v2742_v57 = vpop.eup %2741  ;;  %1893 = vst.msk [vmem:[#allocation3 + $0x8] sm:$0x30] %vm470_vm6, %v1891_v56 }
0x2b3b   :  { %1996 = vrot.lane.b32.xlu1 %v2742_v57, %s2794_s25 }
0x2b3d   :  { %v1025_v39 = vpop.permute.xlu0 %1024 }
0x2b3e   :  { %1027 = vst.msk [vmem:[#allocation6 - $0x6] sm:$0xc0] %vm582_vm5, %v1025_v39 }
0x2b3f   :  { %1452 = vrot.lane.b32.xlu1 %v3140_v17, %s2795_s5  ;;  %v2018_v17 = vld [vmem:[%s3278_s9 + $0x18] sm:$0xff]  ;;  %s2797_s9 = smov [#allocation4]  }
0x2b40   :  { %v2602_v60 = vpack.c.bf16 %v2018_v17, %v2017_v15  ;;  %s2117_s17 = sshll.u32 %s2797_s9, 4  ;;  %s2118_s17 = int_to_ptr.vmem [resolvable:$true] %s2117_s17 }
0x2b41   :  { %s2743_s19 = scalar_lea.vmem %s2118_s17, 64  ;;  %p2748_p1 = scmp.lt.s32.totalorder %s2118_s17, %s2118_s17 }
0x2b42   :  { %2603 = vmatprep.subr.bf16.mxu0 %v2602_v60  ;;  %p2744_p0 = scmp.ne.s32.totalorder %s2118_s17, %s2743_s19  ;;  %p2749_p2 = scmp.lt.s32.totalorder %s2743_s19, %s2743_s19 }
0x2b43   :  { %1779 = vrot.lane.b32.xlu1 %v3181_v11, %s2795_s5  ;;  %2605 = vmatpush3.bf16.msra.mxu0 %v2602_v60 }
0x2b44   :  { %p2750_p3 = por %p2749_p2, %p2748_p1 }
0x2b46   :  { %p2751_p4 = pnand %p2750_p3, %p2744_p0 }
0x2bad   :  { %v1997_v62 = vpop.permute.xlu1 %1996 }
0x2bae   :  { %v1999_v63 = vmul.f32 %v2740_v49, %v1997_v62 }
0x2bb0   :  { %2001 = vrot.lane.b32.xlu1 %v1999_v63, %s2795_s5 }
0x2bb1   :  { %v1453_v7 = vpop.permute.xlu1 %1452 }
0x2bb2   :  { %1455 = vst.msk [vmem:[#allocation3] sm:$0x30] %vm470_vm6, %v1453_v7 }
0x2bb4   :  { %2008 = vrot.lane.b32.xlu1 %v1993_v54, %s2796_s8 }
0x2bb5   :  { %v1780_v0 = vpop.permute.xlu1 %1779 }
0x2bb6   :  { %1782 = vst.msk [vmem:[#allocation3 + $0x8] sm:$0xc] %vm358_vm4, %v1780_v0 }
0x2bb9   :  { %v2013_v2 = vld [vmem:[#allocation3] sm:$0xff] }
0x2bba   :  { %2487 = vmatprep.mubr.msk.f32.mxu0 %vm142_vm2, %v2013_v2 }
0x2c22   :  { %v2002_v61 = vpop.permute.xlu1 %2001 }
0x2c23   :  { %2004 = vst.msk [vmem:[#allocation3 + $0x8] sm:$0xc0] %vm582_vm5, %v2002_v61  ;;  %2006 = vst.msk [vmem:[#allocation4 - $0x4] sm:$0xc0] %vm582_vm5, %v2002_v61 }
0x2c26   :  { %v2009_v4 = vpop.permute.xlu1 %2008 }
0x2c27   :  { %2012 = vst.msk [vmem:[#allocation6 - $0x4] sm:$0xc0] %vm582_vm5, %v2009_v4 }
0x2c2a   :  { %v2014_v10 = vld [vmem:[#allocation3 + $0x8] sm:$0xff] }
0x2c2b   :  { %2488 = vmatmul.mubr.msk.f32.vlgmr.msra.gmra.mrb[18].mxu0 %vm142_vm2, %v2014_v10 }
0x2c2c   :  { %2754 = shalt.err (!%p2751_p4)
}
0x2c2d   :  { %s2755_s22 = scalar_lea.hbm %s3281_s12, 64 }
0x2c2e   :  { %p2756_p5 = scmp.ne.s32.totalorder %s3281_s12, %s2755_s22  ;;  %p2759_p6 = scmp.lt.u32.totalorder %s2755_s22, %s3281_s12 }
0x2c30   :  { %p2761_p7 = pnand %p2759_p6, %p2756_p5 }
0x2c32   :  { %2764 = shalt.err (!%p2761_p7)
}
0x2c33   :  { %s2799_s24 = smov 2   ;;  %s2765_s1 = scalar_lea.vmem %s2130_s18, 64 }
0x2c34   :  { %2123 = dma.vmem_to_hbm [thread:$0]  %s2118_s17, 64, %s3281_s12, [#allocation5], %s2795_s5, %s2795_s5, %s2799_s24  }
0x2c35   :  { %p2766_p8 = scmp.ne.s32.totalorder %s2130_s18, %s2765_s1  ;;  %p2770_p9 = scmp.lt.s32.totalorder %s2130_s18, %s2130_s18 }
0x2c36   :  { %p2771_p10 = scmp.lt.s32.totalorder %s2765_s1, %s2765_s1 }
0x2c38   :  { %p2772_p11 = por %p2771_p10, %p2770_p9 }
0x2c3a   :  { %p2773_p12 = pnand %p2772_p11, %p2766_p8 }
0x2c3c   :  { %2776 = shalt.err (!%p2773_p12)
}
0x2c3d   :  { %s2777_s27 = scalar_lea.hbm %s3282_s13, 64 }
0x2c3e   :  { %p2778_p13 = scmp.ne.s32.totalorder %s3282_s13, %s2777_s27  ;;  %p2781_p0 = scmp.lt.u32.totalorder %s2777_s27, %s3282_s13 }
0x2c40   :  { %p2783_p1 = pnand %p2781_p0, %p2778_p13 }
0x2c42   :  { %2786 = shalt.err (!%p2783_p1)
}
0x2c43   :  { %2135 = dma.vmem_to_hbm [thread:$0]  %s2130_s18, 64, %s3282_s13, [#allocation7], %s2795_s5, %s2795_s5, %s2799_s24   ;;  %vm2107_vm7 = vcmask 523264  }
0x2c44   :  { %v2186_v12 = vld [vmem:[%s3279_s10] ss:$0 sm:$0xff] }
0x2cfe   :  { %v2489_v3 = vpop.f32.mrb[18].mxu0 }
0x2cff   :  { %v2104_v1 = vadd.f32 %v2489_v3, %v2186_v12  ;;  %v2098_v5 = vpop.f32.mrb[19].mxu0 }
0x2d00   :  { %v2099_v6 = vadd.f32 %v2186_v12, %v2098_v5 }
0x2d01   :  { %2109 = vst.msk [vmem:[%s3280_s11 + $0x8] sm:$0xff] %vm2107_vm7, %v2104_v1 }
0x2d02   :  { %2108 = vst.msk [vmem:[%s3280_s11] sm:$0xff] %vm2107_vm7, %v2099_v6 }
0x2d03   :  { %2787 = dma.done.wait [#allocation5], 64  }
0x2d04   :  { %2788 = vsyncadd [#allocation5], 4294967232 }
0x2d05   :  { %2789 = dma.done.wait [#allocation7], 64  }
0x2d06   :  { %2790 = vsyncadd [#allocation7], 4294967232 }
0x2d07   :  { %2144 = vsyncpa [#allocation5], 1 }
0x2d08   :  { %2145 = vsyncpa [#allocation7], 1 }

</bundles_post_ra>
